<compile_context>
chip_gen: v6e
topology: v6e:2x2x1
jax: 0.10.0
libtpu: 0.0.40
codegen_flags: <defaults>
</compile_context>

<pallas_src>
import numpy as np
import jax
import jax.numpy as jnp
from jax.experimental import pallas as pl
from jax.experimental.pallas import tpu as pltpu

# ----------------------------- configuration --------------------------------
D_INPUT, D_MODEL, D_OUTPUT = 12, 32, 6
N_LAYERS = 2
D_STATE = 16          # S4D state size N (N/2 complex modes)
SEQ_LEN = 8
BATCH = 2
# AutoNCP(units=20, output_size=6) structure: 9 inter, 5 command, 6 motor
NCP_INTER, NCP_COMMAND, NCP_MOTOR = 9, 5, 6
SENSORY_FANOUT, INTER_FANOUT, MOTOR_FANIN = 4, 2, 2
LN_EPS = 1e-5

GATE_PAD = 128        # each CfC gate occupies its own vreg-aligned lane block
N_GATES = 3           # ff1, ff2, t (time_a + time_b pre-summed)
CFC_IN_DIMS = (D_MODEL, NCP_INTER, NCP_COMMAND)
CFC_HIDS = (NCP_INTER, NCP_COMMAND, NCP_MOTOR)

_SQRT_2_OVER_PI = 0.7978845608028654
_GELU_C = 0.044715


def _round_up8(n):
    return ((n + 7) // 8) * 8


def _cfc_layout():
    """Row offsets of [W_in | W_rec | bias] per CfC layer in the packed CfC
    slab.  All offsets are multiples of 8 (sublane aligned)."""
    offs, r = [], 0
    for ind, hd in zip(CFC_IN_DIMS, CFC_HIDS):
        win_off = r
        r += _round_up8(ind)
        wrec_off = r
        r += _round_up8(hd)
        b_off = r
        r += 8
        offs.append((win_off, wrec_off, b_off, ind, hd))
    return offs, r


def _gelu(x):
    # tanh-approximate GELU (puts the transcendental on the EUP slot).
    # TODO(synk): nn.GELU default is exact erf; tanh form differs by ~1e-3 max.
    return 0.5 * x * (1.0 + jnp.tanh(_SQRT_2_OVER_PI * (x + _GELU_C * x * x * x)))


# ----------------------------- fused Pallas kernel ---------------------------
def _s4_ncp_kernel(x_ref, toep_ref, w_ref, vec_ref, cfc_ref, out_ref):
    """encoder Linear + N_LAYERS x (S4D + residual + LayerNorm) + mean over L
    + wired-CfC (NCP) decoder, all in one kernel body (no grid)."""
    B, L, DIN = x_ref.shape
    NL = toep_ref.shape[0]
    H = w_ref.shape[1]
    BL = B * L
    enc_rows = _round_up8(DIN)

    vecs = vec_ref[...]                        # (1 + 5*NL, H) row-vector slab

    # ---------------- backbone, canonical (B*L, H) layout --------------------
    x = x_ref[...].reshape(BL, DIN)
    h = (jnp.dot(x, w_ref[0:DIN, :], preferred_element_type=jnp.float32)
         + vecs[0:1, :])

    for li in range(NL):                       # static unroll over layers
        u = h
        # Causal SSM convolution as one per-layer Toeplitz contraction
        #   y[b, l, c] = sum_m T[l, m, c] * u[b, m, c]
        # (T is (L, L, H); no batch-block-diagonal blow-up.)
        u3 = u.reshape(B, L, H)
        y = jnp.sum(toep_ref[li][None, :, :, :] * u3[:, None, :, :], axis=2)
        y = y.reshape(BL, H)

        vb = 1 + li * 5
        d_row = vecs[vb + 0:vb + 1, :]
        gamma = vecs[vb + 1:vb + 2, :]
        beta = vecs[vb + 2:vb + 3, :]
        bc_a = vecs[vb + 3:vb + 4, :]
        bc_b = vecs[vb + 4:vb + 5, :]

        y = _gelu(y + u * d_row)               # D*u skip + GELU (dropout = id)

        # output_linear: Conv1d(H, 2H, 1) + GLU, pre-split into two H-wide halves
        wb = enc_rows + li * 2 * H
        za = jnp.dot(y, w_ref[wb:wb + H, :],
                     preferred_element_type=jnp.float32) + bc_a
        zb = jnp.dot(y, w_ref[wb + H:wb + 2 * H, :],
                     preferred_element_type=jnp.float32) + bc_b
        h = za * jax.nn.sigmoid(zb) + u        # GLU + residual

        # post-norm LayerNorm over d_model (prenorm=False)
        mu = jnp.mean(h, axis=-1, keepdims=True)
        var = jnp.mean(jnp.square(h - mu), axis=-1, keepdims=True)
        h = (h - mu) * jax.lax.rsqrt(var + LN_EPS) * gamma + beta

    pooled = jnp.mean(h.reshape(B, L, H), axis=1)          # (B, H)

    # ---------------- wired CfC (NCP) decoder --------------------------------
    # ncps.torch.CfC semantics for 2-D input: unbatched sequence of length B;
    # hidden state of the inter/command/motor layers chains across rows.
    # Per layer (mode="default", no backbone, timespan = 1.0):
    #   ff1 = tanh(x@W1 + h@R1 + b1); ff2 = tanh(x@W2 + h@R2 + b2)
    #   t   = sigmoid(x@(Wa+Wb) + h@(Ra+Rb) + (ba+bb))
    #   h'  = ff1*(1-t) + t*ff2
    offs, _ = _cfc_layout()
    wins, wrecs, biases = [], [], []
    for (win_off, wrec_off, b_off, ind, hd) in offs:
        wins.append(cfc_ref[win_off:win_off + ind, :])
        wrecs.append(cfc_ref[wrec_off:wrec_off + hd, :])
        biases.append(cfc_ref[b_off:b_off + 1, :])

    # Hoist layer-0's input projection out of the serial recurrence.
    pre0 = jnp.dot(pooled, wins[0], preferred_element_type=jnp.float32) + biases[0]

    states = [jnp.zeros((1, hd), jnp.float32) for hd in CFC_HIDS]
    rows = []
    GP = GATE_PAD
    for t in range(B):                         # static unroll over "sequence"
        cur = None
        for li, (_, _, _, ind, hd) in enumerate(offs):
            rec = jnp.dot(states[li], wrecs[li], preferred_element_type=jnp.float32)
            if li == 0:
                y = pre0[t:t + 1, :] + rec
            else:
                y = (jnp.dot(cur, wins[li], preferred_element_type=jnp.float32)
                     + rec + biases[li])
            # gates are at vreg-aligned lane offsets 0 / 128 / 256
            ff1 = jnp.tanh(y[:, 0:hd])
            ff2 = jnp.tanh(y[:, GP:GP + hd])
            ti = jax.nn.sigmoid(y[:, 2 * GP:2 * GP + hd])
            hnew = ff1 * (1.0 - ti) + ti * ff2
            states[li] = hnew
            cur = hnew                         # feed next NCP layer
        rows.append(cur)                       # (1, d_output)

    out_ref[...] = jnp.concatenate(rows, axis=0)   # single store


# ----------------------------- glue: SSM kernel ------------------------------
def _s4d_kernel_K(log_dt, c_re, c_im, log_A_real, A_imag, L):
    """S4DKernel.forward(L): returns K of shape (H, L)."""
    dt = jnp.exp(log_dt)                                          # (H,)
    C = (c_re + 1j * c_im).astype(jnp.complex64)                  # (H, N/2)
    A = (-jnp.exp(log_A_real) + 1j * A_imag).astype(jnp.complex64)
    dtA = A * dt[:, None]
    C2 = C * (jnp.exp(dtA) - 1.0) / A
    vand = jnp.exp(dtA[:, :, None] * jnp.arange(L, dtype=jnp.float32))   # (H,N/2,L)
    K = 2.0 * jnp.real(jnp.einsum('hn,hnl->hl', C2, vand))
    return K.astype(jnp.float32)


# ----------------------------- parameter init --------------------------------
def _fanout_mask(rng, n_src, n_dst, fanout):
    m = np.zeros((n_src, n_dst), np.float32)
    for i in range(n_src):
        m[i, rng.choice(n_dst, size=fanout, replace=False)] = 1.0
    for j in range(n_dst):                      # make sure every target is reached
        if m[:, j].sum() == 0:
            m[rng.choice(n_src, size=min(fanout, n_src), replace=False), j] = 1.0
    return m


def _fanin_mask(rng, n_src, n_dst, fanin):
    m = np.zeros((n_src, n_dst), np.float32)
    for j in range(n_dst):
        m[rng.choice(n_src, size=fanin, replace=False), j] = 1.0
    for i in range(n_src):
        if m[i, :].sum() == 0:
            m[i, rng.choice(n_src, size=min(fanin, n_dst), replace=False)] = 1.0
    return m


def _make_cfc_layer(key, in_dim, hid, in_mask):
    """One WiredCfCCell layer: pre-masked [W_ff1 | W_ff2 | W_ta | W_tb]."""
    cat = in_dim + hid
    mask = jnp.concatenate([jnp.asarray(in_mask, jnp.float32),
                            jnp.ones((hid, hid), jnp.float32)], axis=0)   # (cat, hid)
    ks = jax.random.split(key, 8)
    sc = 1.0 / np.sqrt(cat)

    def u(k, shape):
        return jax.random.uniform(k, shape, jnp.float32, -sc, sc)

    w1 = u(ks[0], (cat, hid)) * mask            # ff1 / ff2 are sparsity-masked
    w2 = u(ks[1], (cat, hid)) * mask
    wa = u(ks[2], (cat, hid))                   # time_a / time_b are dense
    wb = u(ks[3], (cat, hid))
    b1, b2, ba, bb = (u(ks[4], (hid,)), u(ks[5], (hid,)),
                      u(ks[6], (hid,)), u(ks[7], (hid,)))
    wcat = jnp.concatenate([w1, w2, wa, wb], axis=1)            # (cat, 4*hid)
    bcat = jnp.concatenate([b1, b2, ba, bb]).reshape(1, 4 * hid)
    return wcat, bcat


def init_params(key):
    keys = jax.random.split(key, 4 + N_LAYERS)

    # encoder nn.Linear(d_input, d_model)
    ke1, ke2 = jax.random.split(keys[0])
    sc = 1.0 / np.sqrt(D_INPUT)
    wenc_t = jax.random.uniform(ke1, (D_INPUT, D_MODEL), jnp.float32, -sc, sc)
    benc = jax.random.uniform(ke2, (1, D_MODEL), jnp.float32, -sc, sc)

    s4_layers, ln_params = [], []
    n2 = D_STATE // 2
    for li in range(N_LAYERS):
        kl = jax.random.split(keys[1 + li], 6)
        log_dt = (jax.random.uniform(kl[0], (D_MODEL,), jnp.float32)
                  * (np.log(0.1) - np.log(0.001)) + np.log(0.001))
        c_re = jax.random.normal(kl[1], (D_MODEL, n2), jnp.float32)
        c_im = jax.random.normal(kl[2], (D_MODEL, n2), jnp.float32)
        log_A_real = jnp.log(0.5 * jnp.ones((D_MODEL, n2), jnp.float32))
        A_imag = np.pi * jnp.broadcast_to(
            jnp.arange(n2, dtype=jnp.float32), (D_MODEL, n2))
        D = jax.random.normal(kl[3], (D_MODEL,), jnp.float32)
        scc = 1.0 / np.sqrt(D_MODEL)
        wconv_t = jax.random.uniform(kl[4], (D_MODEL, 2 * D_MODEL), jnp.float32, -scc, scc)
        bconv = jax.random.uniform(kl[5], (2 * D_MODEL,), jnp.float32, -scc, scc)
        s4_layers.append((log_dt, c_re, c_im, log_A_real, A_imag, D, wconv_t, bconv))
        # LayerNorm: PyTorch default weight=1, bias=0
        ln_params.append((jnp.ones((D_MODEL,), jnp.float32),
                          jnp.zeros((D_MODEL,), jnp.float32)))

    # TODO(synk): exact AutoNCP RandomState(22222) wiring not replicated bit-for-bit;
    # deterministic surrogate masks with the same layer sizes / fan-outs are used.
    rng = np.random.default_rng(22222)
    mask_si = _fanout_mask(rng, D_MODEL, NCP_INTER, SENSORY_FANOUT)
    mask_ic = _fanout_mask(rng, NCP_INTER, NCP_COMMAND, INTER_FANOUT)
    mask_cm = _fanin_mask(rng, NCP_COMMAND, NCP_MOTOR, MOTOR_FANIN)
    kc = jax.random.split(keys[1 + N_LAYERS], 3)
    cfc_params = [
        _make_cfc_layer(kc[0], D_MODEL, NCP_INTER, mask_si),
        _make_cfc_layer(kc[1], NCP_INTER, NCP_COMMAND, mask_ic),
        _make_cfc_layer(kc[2], NCP_COMMAND, NCP_MOTOR, mask_cm),
    ]
    return (wenc_t, benc, s4_layers, ln_params, cfc_params)


# ----------------------------- one-time preprocessing ------------------------
def prepare_params(params, L):
    """Hoisted out of the per-call path: compute the S4D kernels K, build the
    per-layer (L, L, H) Toeplitz convolution tensors, and pack every weight
    into 4 slabs (Toeplitz, matmul weights, row vectors, CfC).  Call ONCE."""
    wenc_t, benc, s4_layers, ln_params, cfc_params = params
    H = wenc_t.shape[1]
    NL = len(s4_layers)

    idx = jnp.arange(L)
    diff = idx[:, None] - idx[None, :]                      # (L, L)
    causal = (diff >= 0)[:, :, None]                        # (L, L, 1)

    enc_rows = _round_up8(D_INPUT)
    w_slab = jnp.zeros((enc_rows + NL * 2 * H, H), jnp.float32)
    w_slab = w_slab.at[0:D_INPUT, :].set(wenc_t)
    vec_slab = jnp.zeros((1 + NL * 5, H), jnp.float32)
    vec_slab = vec_slab.at[0, :].set(benc.reshape(-1))

    toep_l = []
    for li, (log_dt, c_re, c_im, log_A_real, A_imag, D, wconv_t, bconv) \
            in enumerate(s4_layers):
        K = _s4d_kernel_K(log_dt, c_re, c_im, log_A_real, A_imag, L)   # (H, L)
        Kt = K.T                                                       # (L, H)
        # T[l, m, h] = K[h, l-m] for l >= m else 0   (per-layer, no batch blowup)
        T = jnp.where(causal, Kt[jnp.clip(diff, 0, L - 1)], 0.0)       # (L, L, H)
        toep_l.append(T)

        wb = enc_rows + li * 2 * H
        w_slab = w_slab.at[wb:wb + H, :].set(wconv_t[:, :H])           # GLU half a
        w_slab = w_slab.at[wb + H:wb + 2 * H, :].set(wconv_t[:, H:])   # GLU half b

        gamma, beta = ln_params[li]
        vb = 1 + li * 5
        vec_slab = vec_slab.at[vb + 0, :].set(D)
        vec_slab = vec_slab.at[vb + 1, :].set(gamma)
        vec_slab = vec_slab.at[vb + 2, :].set(beta)
        vec_slab = vec_slab.at[vb + 3, :].set(bconv[:H])
        vec_slab = vec_slab.at[vb + 4, :].set(bconv[H:])

    toep_all = jnp.stack(toep_l)                 # (NL, L, L, H)

    # CfC slab: per layer [W_in | W_rec | bias]; each gate (ff1, ff2, t) sits
    # in its own 128-lane-aligned column block; time_a/time_b pre-summed
    # (exact for timespan = 1.0).
    offs, total_rows = _cfc_layout()
    cfc_slab = jnp.zeros((total_rows, N_GATES * GATE_PAD), jnp.float32)
    for (win_off, wrec_off, b_off, ind, hd), (wcat, bcat) in zip(offs, cfc_params):
        w_in, w_rec = wcat[:ind, :], wcat[ind:, :]
        b = bcat.reshape(-1)

        def gate(mat, g):
            return mat[:, g * hd:(g + 1) * hd]

        gates = [
            (gate(w_in, 0), gate(w_rec, 0), b[0 * hd:1 * hd]),
            (gate(w_in, 1), gate(w_rec, 1), b[1 * hd:2 * hd]),
            (gate(w_in, 2) + gate(w_in, 3), gate(w_rec, 2) + gate(w_rec, 3),
             b[2 * hd:3 * hd] + b[3 * hd:4 * hd]),
        ]
        for g, (wi_g, wr_g, b_g) in enumerate(gates):
            c0 = g * GATE_PAD
            cfc_slab = cfc_slab.at[win_off:win_off + ind, c0:c0 + hd].set(wi_g)
            cfc_slab = cfc_slab.at[wrec_off:wrec_off + hd, c0:c0 + hd].set(wr_g)
            cfc_slab = cfc_slab.at[b_off, c0:c0 + hd].set(b_g)

    # TODO(synk): bf16 weight/Toeplitz storage (v6e/v7x) and a batch grid for
    # v7x's second TensorCore are worthwhile only when B/L are scaled up.
    return (toep_all, w_slab, vec_slab, cfc_slab)


# ----------------------------- forward wrapper -------------------------------
def s4model_forward(x, prepared):
    """x: (B, L, d_input) float32  ->  (B, d_output) float32.  One pallas_call."""
    toep_all, w_slab, vec_slab, cfc_slab = prepared
    B = x.shape[0]

    vmem = pl.BlockSpec(memory_space=pltpu.MemorySpace.VMEM)
    out = pl.pallas_call(
        _s4_ncp_kernel,
        out_shape=jax.ShapeDtypeStruct((B, NCP_MOTOR), jnp.float32),
        in_specs=[vmem] * 5,
        out_specs=vmem,
    )(x, toep_all, w_slab, vec_slab, cfc_slab)
    return out


# ----------------------------- main ------------------------------------------
if __name__ == "__main__":
    key = jax.random.PRNGKey(0)
    k_param, k_x = jax.random.split(key)
    params = init_params(k_param)
    x = jax.random.normal(k_x, (BATCH, SEQ_LEN, D_INPUT), jnp.float32)

    # All preprocessing (SSM kernels, Toeplitz, slab packing) done once.
    prepared = prepare_params(params, SEQ_LEN)

    fwd = jax.jit(s4model_forward)
    out = fwd(x, prepared)
    out = jax.block_until_ready(out)

    assert out.shape == (BATCH, D_OUTPUT), out.shape
    assert out.dtype == jnp.float32
    assert bool(jnp.all(jnp.isfinite(out)))
    print("KERNEL_OK")
</pallas_src>

<mosaic_0001>
module attributes {stable_mosaic.version = 11 : i64} {
  func.func @_s4_ncp_kernel(%arg0: memref<2x8x12xf32, #tpu.memory_space<vmem>>, %arg1: memref<2x8x8x32xf32, #tpu.memory_space<vmem>>, %arg2: memref<144x32xf32, #tpu.memory_space<vmem>>, %arg3: memref<11x32xf32, #tpu.memory_space<vmem>>, %arg4: memref<112x384xf32, #tpu.memory_space<vmem>>, %arg5: memref<2x6xf32, #tpu.memory_space<vmem>>) attributes {dimension_semantics = [], scalar_prefetch = 0 : i64, scratch_operands = 0 : i64, tpu.core_type = #tpu.core_type<tc>} {
    %c0 = arith.constant 0 : index
    %c0_0 = arith.constant 0 : index
    %0 = vector.load %arg3[%c0, %c0_0] : memref<11x32xf32, #tpu.memory_space<vmem>>, vector<11x32xf32>
    %c0_1 = arith.constant 0 : index
    %c0_2 = arith.constant 0 : index
    %c0_3 = arith.constant 0 : index
    %1 = vector.load %arg0[%c0_1, %c0_2, %c0_3] : memref<2x8x12xf32, #tpu.memory_space<vmem>>, vector<2x8x12xf32>
    %2 = vector.shape_cast %1 : vector<2x8x12xf32> to vector<16x12xf32>
    %c0_4 = arith.constant 0 : index
    %c0_5 = arith.constant 0 : index
    %3 = vector.load %arg2[%c0_4, %c0_5] : memref<144x32xf32, #tpu.memory_space<vmem>>, vector<12x32xf32>
    %cst = arith.constant dense<0.000000e+00> : vector<16x32xf32>
    %4 = tpu.matmul %2, %3, %cst {dimension_numbers = #tpu.dot_dimension_numbers<[1], [0], [0], [1], [0, 0, 1, 1], [], []>} : vector<16x12xf32>, vector<12x32xf32>, vector<16x32xf32> -> vector<16x32xf32>
    %5 = vector.extract_strided_slice %0 {offsets = [0, 0], sizes = [1, 32], strides = [1, 1]} : vector<11x32xf32> to vector<1x32xf32>
    %6 = vector.broadcast %5 : vector<1x32xf32> to vector<16x32xf32>
    %7 = arith.addf %4, %6 : vector<16x32xf32>
    %8 = vector.shape_cast %7 : vector<16x32xf32> to vector<2x8x32xf32>
    %c0_6 = arith.constant 0 : index
    %c0_7 = arith.constant 0 : index
    %c0_8 = arith.constant 0 : index
    %c0_9 = arith.constant 0 : index
    %9 = vector.load %arg1[%c0_6, %c0_7, %c0_8, %c0_9] : memref<2x8x8x32xf32, #tpu.memory_space<vmem>>, vector<1x8x8x32xf32>
    %10 = vector.shape_cast %9 : vector<1x8x8x32xf32> to vector<8x8x32xf32>
    %11 = vector.shape_cast %10 : vector<8x8x32xf32> to vector<1x8x8x32xf32>
    %12 = vector.shape_cast %8 : vector<2x8x32xf32> to vector<2x1x8x32xf32>
    %13 = vector.broadcast %11 : vector<1x8x8x32xf32> to vector<2x8x8x32xf32>
    %14 = vector.broadcast %12 : vector<2x1x8x32xf32> to vector<2x8x8x32xf32>
    %15 = arith.mulf %13, %14 : vector<2x8x8x32xf32>
    %cst_10 = arith.constant dense<0.000000e+00> : vector<2x8x32xf32>
    %16 = vector.multi_reduction <add>, %15, %cst_10 [2] : vector<2x8x8x32xf32> to vector<2x8x32xf32>
    %17 = vector.shape_cast %16 : vector<2x8x32xf32> to vector<16x32xf32>
    %18 = vector.extract_strided_slice %0 {offsets = [1, 0], sizes = [1, 32], strides = [1, 1]} : vector<11x32xf32> to vector<1x32xf32>
    %19 = vector.extract_strided_slice %0 {offsets = [2, 0], sizes = [1, 32], strides = [1, 1]} : vector<11x32xf32> to vector<1x32xf32>
    %20 = vector.extract_strided_slice %0 {offsets = [3, 0], sizes = [1, 32], strides = [1, 1]} : vector<11x32xf32> to vector<1x32xf32>
    %21 = vector.extract_strided_slice %0 {offsets = [4, 0], sizes = [1, 32], strides = [1, 1]} : vector<11x32xf32> to vector<1x32xf32>
    %22 = vector.extract_strided_slice %0 {offsets = [5, 0], sizes = [1, 32], strides = [1, 1]} : vector<11x32xf32> to vector<1x32xf32>
    %23 = vector.broadcast %18 : vector<1x32xf32> to vector<16x32xf32>
    %24 = arith.mulf %7, %23 : vector<16x32xf32>
    %25 = arith.addf %17, %24 : vector<16x32xf32>
    %cst_11 = arith.constant 5.000000e-01 : f32
    %26 = vector.broadcast %cst_11 : f32 to vector<16x32xf32>
    %27 = arith.mulf %26, %25 : vector<16x32xf32>
    %cst_12 = arith.constant 4.471500e-02 : f32
    %28 = vector.broadcast %cst_12 : f32 to vector<16x32xf32>
    %29 = arith.mulf %28, %25 : vector<16x32xf32>
    %30 = arith.mulf %29, %25 : vector<16x32xf32>
    %31 = arith.mulf %30, %25 : vector<16x32xf32>
    %32 = arith.addf %25, %31 : vector<16x32xf32>
    %cst_13 = arith.constant 0.797884583 : f32
    %33 = vector.broadcast %cst_13 : f32 to vector<16x32xf32>
    %34 = arith.mulf %33, %32 : vector<16x32xf32>
    %35 = math.tanh %34 : vector<16x32xf32>
    %cst_14 = arith.constant 1.000000e+00 : f32
    %36 = vector.broadcast %cst_14 : f32 to vector<16x32xf32>
    %37 = arith.addf %36, %35 : vector<16x32xf32>
    %38 = arith.mulf %27, %37 : vector<16x32xf32>
    %c16 = arith.constant 16 : index
    %c0_15 = arith.constant 0 : index
    %39 = vector.load %arg2[%c16, %c0_15] : memref<144x32xf32, #tpu.memory_space<vmem>>, vector<32x32xf32>
    %cst_16 = arith.constant dense<0.000000e+00> : vector<16x32xf32>
    %40 = tpu.matmul %38, %39, %cst_16 {dimension_numbers = #tpu.dot_dimension_numbers<[1], [0], [0], [1], [0, 0, 1, 1], [], []>} : vector<16x32xf32>, vector<32x32xf32>, vector<16x32xf32> -> vector<16x32xf32>
    %41 = vector.broadcast %21 : vector<1x32xf32> to vector<16x32xf32>
    %42 = arith.addf %40, %41 : vector<16x32xf32>
    %c48 = arith.constant 48 : index
    %c0_17 = arith.constant 0 : index
    %43 = vector.load %arg2[%c48, %c0_17] : memref<144x32xf32, #tpu.memory_space<vmem>>, vector<32x32xf32>
    %cst_18 = arith.constant dense<0.000000e+00> : vector<16x32xf32>
    %44 = tpu.matmul %38, %43, %cst_18 {dimension_numbers = #tpu.dot_dimension_numbers<[1], [0], [0], [1], [0, 0, 1, 1], [], []>} : vector<16x32xf32>, vector<32x32xf32>, vector<16x32xf32> -> vector<16x32xf32>
    %45 = vector.broadcast %22 : vector<1x32xf32> to vector<16x32xf32>
    %46 = arith.addf %44, %45 : vector<16x32xf32>
    %47 = arith.negf %46 : vector<16x32xf32>
    %48 = math.exp %47 : vector<16x32xf32>
    %cst_19 = arith.constant 1.000000e+00 : f32
    %49 = vector.broadcast %cst_19 : f32 to vector<16x32xf32>
    %50 = arith.addf %49, %48 : vector<16x32xf32>
    %51 = arith.divf %49, %50 : vector<16x32xf32>
    %52 = arith.mulf %42, %51 : vector<16x32xf32>
    %53 = arith.addf %52, %7 : vector<16x32xf32>
    %cst_20 = arith.constant dense<0.000000e+00> : vector<16xf32>
    %54 = vector.multi_reduction <add>, %53, %cst_20 [1] : vector<16x32xf32> to vector<16xf32>
    %55 = vector.shape_cast %54 : vector<16xf32> to vector<16x1xf32>
    %cst_21 = arith.constant 3.200000e+01 : f32
    %56 = vector.broadcast %cst_21 : f32 to vector<16x1xf32>
    %57 = arith.divf %55, %56 : vector<16x1xf32>
    %58 = vector.broadcast %57 : vector<16x1xf32> to vector<16x32xf32>
    %59 = arith.subf %53, %58 : vector<16x32xf32>
    %60 = arith.mulf %59, %59 : vector<16x32xf32>
    %cst_22 = arith.constant dense<0.000000e+00> : vector<16xf32>
    %61 = vector.multi_reduction <add>, %60, %cst_22 [1] : vector<16x32xf32> to vector<16xf32>
    %62 = vector.shape_cast %61 : vector<16xf32> to vector<16x1xf32>
    %cst_23 = arith.constant 3.200000e+01 : f32
    %63 = vector.broadcast %cst_23 : f32 to vector<16x1xf32>
    %64 = arith.divf %62, %63 : vector<16x1xf32>
    %65 = vector.broadcast %57 : vector<16x1xf32> to vector<16x32xf32>
    %66 = arith.subf %53, %65 : vector<16x32xf32>
    %cst_24 = arith.constant 9.99999974E-6 : f32
    %67 = vector.broadcast %cst_24 : f32 to vector<16x1xf32>
    %68 = arith.addf %64, %67 : vector<16x1xf32>
    %69 = math.rsqrt %68 : vector<16x1xf32>
    %70 = vector.broadcast %69 : vector<16x1xf32> to vector<16x32xf32>
    %71 = arith.mulf %66, %70 : vector<16x32xf32>
    %72 = vector.broadcast %19 : vector<1x32xf32> to vector<16x32xf32>
    %73 = arith.mulf %71, %72 : vector<16x32xf32>
    %74 = vector.broadcast %20 : vector<1x32xf32> to vector<16x32xf32>
    %75 = arith.addf %73, %74 : vector<16x32xf32>
    %76 = vector.shape_cast %75 : vector<16x32xf32> to vector<2x8x32xf32>
    %c1 = arith.constant 1 : index
    %c0_25 = arith.constant 0 : index
    %c0_26 = arith.constant 0 : index
    %c0_27 = arith.constant 0 : index
    %77 = vector.load %arg1[%c1, %c0_25, %c0_26, %c0_27] : memref<2x8x8x32xf32, #tpu.memory_space<vmem>>, vector<1x8x8x32xf32>
    %78 = vector.shape_cast %77 : vector<1x8x8x32xf32> to vector<8x8x32xf32>
    %79 = vector.shape_cast %78 : vector<8x8x32xf32> to vector<1x8x8x32xf32>
    %80 = vector.shape_cast %76 : vector<2x8x32xf32> to vector<2x1x8x32xf32>
    %81 = vector.broadcast %79 : vector<1x8x8x32xf32> to vector<2x8x8x32xf32>
    %82 = vector.broadcast %80 : vector<2x1x8x32xf32> to vector<2x8x8x32xf32>
    %83 = arith.mulf %81, %82 : vector<2x8x8x32xf32>
    %cst_28 = arith.constant dense<0.000000e+00> : vector<2x8x32xf32>
    %84 = vector.multi_reduction <add>, %83, %cst_28 [2] : vector<2x8x8x32xf32> to vector<2x8x32xf32>
    %85 = vector.shape_cast %84 : vector<2x8x32xf32> to vector<16x32xf32>
    %86 = vector.extract_strided_slice %0 {offsets = [6, 0], sizes = [1, 32], strides = [1, 1]} : vector<11x32xf32> to vector<1x32xf32>
    %87 = vector.extract_strided_slice %0 {offsets = [7, 0], sizes = [1, 32], strides = [1, 1]} : vector<11x32xf32> to vector<1x32xf32>
    %88 = vector.extract_strided_slice %0 {offsets = [8, 0], sizes = [1, 32], strides = [1, 1]} : vector<11x32xf32> to vector<1x32xf32>
    %89 = vector.extract_strided_slice %0 {offsets = [9, 0], sizes = [1, 32], strides = [1, 1]} : vector<11x32xf32> to vector<1x32xf32>
    %90 = vector.extract_strided_slice %0 {offsets = [10, 0], sizes = [1, 32], strides = [1, 1]} : vector<11x32xf32> to vector<1x32xf32>
    %91 = vector.broadcast %86 : vector<1x32xf32> to vector<16x32xf32>
    %92 = arith.mulf %75, %91 : vector<16x32xf32>
    %93 = arith.addf %85, %92 : vector<16x32xf32>
    %cst_29 = arith.constant 5.000000e-01 : f32
    %94 = vector.broadcast %cst_29 : f32 to vector<16x32xf32>
    %95 = arith.mulf %94, %93 : vector<16x32xf32>
    %cst_30 = arith.constant 4.471500e-02 : f32
    %96 = vector.broadcast %cst_30 : f32 to vector<16x32xf32>
    %97 = arith.mulf %96, %93 : vector<16x32xf32>
    %98 = arith.mulf %97, %93 : vector<16x32xf32>
    %99 = arith.mulf %98, %93 : vector<16x32xf32>
    %100 = arith.addf %93, %99 : vector<16x32xf32>
    %cst_31 = arith.constant 0.797884583 : f32
    %101 = vector.broadcast %cst_31 : f32 to vector<16x32xf32>
    %102 = arith.mulf %101, %100 : vector<16x32xf32>
    %103 = math.tanh %102 : vector<16x32xf32>
    %cst_32 = arith.constant 1.000000e+00 : f32
    %104 = vector.broadcast %cst_32 : f32 to vector<16x32xf32>
    %105 = arith.addf %104, %103 : vector<16x32xf32>
    %106 = arith.mulf %95, %105 : vector<16x32xf32>
    %c80 = arith.constant 80 : index
    %c0_33 = arith.constant 0 : index
    %107 = vector.load %arg2[%c80, %c0_33] : memref<144x32xf32, #tpu.memory_space<vmem>>, vector<32x32xf32>
    %cst_34 = arith.constant dense<0.000000e+00> : vector<16x32xf32>
    %108 = tpu.matmul %106, %107, %cst_34 {dimension_numbers = #tpu.dot_dimension_numbers<[1], [0], [0], [1], [0, 0, 1, 1], [], []>} : vector<16x32xf32>, vector<32x32xf32>, vector<16x32xf32> -> vector<16x32xf32>
    %109 = vector.broadcast %89 : vector<1x32xf32> to vector<16x32xf32>
    %110 = arith.addf %108, %109 : vector<16x32xf32>
    %c112 = arith.constant 112 : index
    %c0_35 = arith.constant 0 : index
    %111 = vector.load %arg2[%c112, %c0_35] : memref<144x32xf32, #tpu.memory_space<vmem>>, vector<32x32xf32>
    %cst_36 = arith.constant dense<0.000000e+00> : vector<16x32xf32>
    %112 = tpu.matmul %106, %111, %cst_36 {dimension_numbers = #tpu.dot_dimension_numbers<[1], [0], [0], [1], [0, 0, 1, 1], [], []>} : vector<16x32xf32>, vector<32x32xf32>, vector<16x32xf32> -> vector<16x32xf32>
    %113 = vector.broadcast %90 : vector<1x32xf32> to vector<16x32xf32>
    %114 = arith.addf %112, %113 : vector<16x32xf32>
    %115 = arith.negf %114 : vector<16x32xf32>
    %116 = math.exp %115 : vector<16x32xf32>
    %cst_37 = arith.constant 1.000000e+00 : f32
    %117 = vector.broadcast %cst_37 : f32 to vector<16x32xf32>
    %118 = arith.addf %117, %116 : vector<16x32xf32>
    %119 = arith.divf %117, %118 : vector<16x32xf32>
    %120 = arith.mulf %110, %119 : vector<16x32xf32>
    %121 = arith.addf %120, %75 : vector<16x32xf32>
    %cst_38 = arith.constant dense<0.000000e+00> : vector<16xf32>
    %122 = vector.multi_reduction <add>, %121, %cst_38 [1] : vector<16x32xf32> to vector<16xf32>
    %123 = vector.shape_cast %122 : vector<16xf32> to vector<16x1xf32>
    %cst_39 = arith.constant 3.200000e+01 : f32
    %124 = vector.broadcast %cst_39 : f32 to vector<16x1xf32>
    %125 = arith.divf %123, %124 : vector<16x1xf32>
    %126 = vector.broadcast %125 : vector<16x1xf32> to vector<16x32xf32>
    %127 = arith.subf %121, %126 : vector<16x32xf32>
    %128 = arith.mulf %127, %127 : vector<16x32xf32>
    %cst_40 = arith.constant dense<0.000000e+00> : vector<16xf32>
    %129 = vector.multi_reduction <add>, %128, %cst_40 [1] : vector<16x32xf32> to vector<16xf32>
    %130 = vector.shape_cast %129 : vector<16xf32> to vector<16x1xf32>
    %cst_41 = arith.constant 3.200000e+01 : f32
    %131 = vector.broadcast %cst_41 : f32 to vector<16x1xf32>
    %132 = arith.divf %130, %131 : vector<16x1xf32>
    %133 = vector.broadcast %125 : vector<16x1xf32> to vector<16x32xf32>
    %134 = arith.subf %121, %133 : vector<16x32xf32>
    %cst_42 = arith.constant 9.99999974E-6 : f32
    %135 = vector.broadcast %cst_42 : f32 to vector<16x1xf32>
    %136 = arith.addf %132, %135 : vector<16x1xf32>
    %137 = math.rsqrt %136 : vector<16x1xf32>
    %138 = vector.broadcast %137 : vector<16x1xf32> to vector<16x32xf32>
    %139 = arith.mulf %134, %138 : vector<16x32xf32>
    %140 = vector.broadcast %87 : vector<1x32xf32> to vector<16x32xf32>
    %141 = arith.mulf %139, %140 : vector<16x32xf32>
    %142 = vector.broadcast %88 : vector<1x32xf32> to vector<16x32xf32>
    %143 = arith.addf %141, %142 : vector<16x32xf32>
    %144 = vector.shape_cast %143 : vector<16x32xf32> to vector<2x8x32xf32>
    %cst_43 = arith.constant dense<0.000000e+00> : vector<2x32xf32>
    %145 = vector.multi_reduction <add>, %144, %cst_43 [1] : vector<2x8x32xf32> to vector<2x32xf32>
    %cst_44 = arith.constant 8.000000e+00 : f32
    %146 = vector.broadcast %cst_44 : f32 to vector<2x32xf32>
    %147 = arith.divf %145, %146 : vector<2x32xf32>
    %c0_45 = arith.constant 0 : index
    %c0_46 = arith.constant 0 : index
    %148 = vector.load %arg4[%c0_45, %c0_46] : memref<112x384xf32, #tpu.memory_space<vmem>>, vector<32x384xf32>
    %c32 = arith.constant 32 : index
    %c0_47 = arith.constant 0 : index
    %149 = vector.load %arg4[%c32, %c0_47] : memref<112x384xf32, #tpu.memory_space<vmem>>, vector<9x384xf32>
    %c48_48 = arith.constant 48 : index
    %c0_49 = arith.constant 0 : index
    %150 = vector.load %arg4[%c48_48, %c0_49] : memref<112x384xf32, #tpu.memory_space<vmem>>, vector<1x384xf32>
    %c56 = arith.constant 56 : index
    %c0_50 = arith.constant 0 : index
    %151 = vector.load %arg4[%c56, %c0_50] : memref<112x384xf32, #tpu.memory_space<vmem>>, vector<9x384xf32>
    %c72 = arith.constant 72 : index
    %c0_51 = arith.constant 0 : index
    %152 = vector.load %arg4[%c72, %c0_51] : memref<112x384xf32, #tpu.memory_space<vmem>>, vector<5x384xf32>
    %c80_52 = arith.constant 80 : index
    %c0_53 = arith.constant 0 : index
    %153 = vector.load %arg4[%c80_52, %c0_53] : memref<112x384xf32, #tpu.memory_space<vmem>>, vector<1x384xf32>
    %c88 = arith.constant 88 : index
    %c0_54 = arith.constant 0 : index
    %154 = vector.load %arg4[%c88, %c0_54] : memref<112x384xf32, #tpu.memory_space<vmem>>, vector<5x384xf32>
    %c96 = arith.constant 96 : index
    %c0_55 = arith.constant 0 : index
    %155 = vector.load %arg4[%c96, %c0_55] : memref<112x384xf32, #tpu.memory_space<vmem>>, vector<6x384xf32>
    %c104 = arith.constant 104 : index
    %c0_56 = arith.constant 0 : index
    %156 = vector.load %arg4[%c104, %c0_56] : memref<112x384xf32, #tpu.memory_space<vmem>>, vector<1x384xf32>
    %cst_57 = arith.constant dense<0.000000e+00> : vector<2x384xf32>
    %157 = tpu.matmul %147, %148, %cst_57 {dimension_numbers = #tpu.dot_dimension_numbers<[1], [0], [0], [1], [0, 0, 1, 1], [], []>} : vector<2x32xf32>, vector<32x384xf32>, vector<2x384xf32> -> vector<2x384xf32>
    %158 = vector.broadcast %150 : vector<1x384xf32> to vector<2x384xf32>
    %159 = arith.addf %157, %158 : vector<2x384xf32>
    %cst_58 = arith.constant 0.000000e+00 : f32
    %160 = vector.broadcast %cst_58 : f32 to vector<1x9xf32>
    %cst_59 = arith.constant 0.000000e+00 : f32
    %161 = vector.broadcast %cst_59 : f32 to vector<1x5xf32>
    %cst_60 = arith.constant 0.000000e+00 : f32
    %162 = vector.broadcast %cst_60 : f32 to vector<1x6xf32>
    %cst_61 = arith.constant dense<0.000000e+00> : vector<1x384xf32>
    %163 = tpu.matmul %160, %149, %cst_61 {dimension_numbers = #tpu.dot_dimension_numbers<[1], [0], [0], [1], [0, 0, 1, 1], [], []>} : vector<1x9xf32>, vector<9x384xf32>, vector<1x384xf32> -> vector<1x384xf32>
    %164 = vector.extract_strided_slice %159 {offsets = [0, 0], sizes = [1, 384], strides = [1, 1]} : vector<2x384xf32> to vector<1x384xf32>
    %165 = arith.addf %164, %163 : vector<1x384xf32>
    %166 = vector.extract_strided_slice %165 {offsets = [0, 0], sizes = [1, 9], strides = [1, 1]} : vector<1x384xf32> to vector<1x9xf32>
    %167 = math.tanh %166 : vector<1x9xf32>
    %168 = vector.extract_strided_slice %165 {offsets = [0, 128], sizes = [1, 9], strides = [1, 1]} : vector<1x384xf32> to vector<1x9xf32>
    %169 = math.tanh %168 : vector<1x9xf32>
    %170 = vector.extract_strided_slice %165 {offsets = [0, 256], sizes = [1, 9], strides = [1, 1]} : vector<1x384xf32> to vector<1x9xf32>
    %171 = arith.negf %170 : vector<1x9xf32>
    %172 = math.exp %171 : vector<1x9xf32>
    %cst_62 = arith.constant 1.000000e+00 : f32
    %173 = vector.broadcast %cst_62 : f32 to vector<1x9xf32>
    %174 = arith.addf %173, %172 : vector<1x9xf32>
    %175 = arith.divf %173, %174 : vector<1x9xf32>
    %cst_63 = arith.constant 1.000000e+00 : f32
    %176 = vector.broadcast %cst_63 : f32 to vector<1x9xf32>
    %177 = arith.subf %176, %175 : vector<1x9xf32>
    %178 = arith.mulf %167, %177 : vector<1x9xf32>
    %179 = arith.mulf %175, %169 : vector<1x9xf32>
    %180 = arith.addf %178, %179 : vector<1x9xf32>
    %cst_64 = arith.constant dense<0.000000e+00> : vector<1x384xf32>
    %181 = tpu.matmul %161, %152, %cst_64 {dimension_numbers = #tpu.dot_dimension_numbers<[1], [0], [0], [1], [0, 0, 1, 1], [], []>} : vector<1x5xf32>, vector<5x384xf32>, vector<1x384xf32> -> vector<1x384xf32>
    %cst_65 = arith.constant dense<0.000000e+00> : vector<1x384xf32>
    %182 = tpu.matmul %180, %151, %cst_65 {dimension_numbers = #tpu.dot_dimension_numbers<[1], [0], [0], [1], [0, 0, 1, 1], [], []>} : vector<1x9xf32>, vector<9x384xf32>, vector<1x384xf32> -> vector<1x384xf32>
    %183 = arith.addf %182, %181 : vector<1x384xf32>
    %184 = arith.addf %183, %153 : vector<1x384xf32>
    %185 = vector.extract_strided_slice %184 {offsets = [0, 0], sizes = [1, 5], strides = [1, 1]} : vector<1x384xf32> to vector<1x5xf32>
    %186 = math.tanh %185 : vector<1x5xf32>
    %187 = vector.extract_strided_slice %184 {offsets = [0, 128], sizes = [1, 5], strides = [1, 1]} : vector<1x384xf32> to vector<1x5xf32>
    %188 = math.tanh %187 : vector<1x5xf32>
    %189 = vector.extract_strided_slice %184 {offsets = [0, 256], sizes = [1, 5], strides = [1, 1]} : vector<1x384xf32> to vector<1x5xf32>
    %190 = arith.negf %189 : vector<1x5xf32>
    %191 = math.exp %190 : vector<1x5xf32>
    %cst_66 = arith.constant 1.000000e+00 : f32
    %192 = vector.broadcast %cst_66 : f32 to vector<1x5xf32>
    %193 = arith.addf %192, %191 : vector<1x5xf32>
    %194 = arith.divf %192, %193 : vector<1x5xf32>
    %cst_67 = arith.constant 1.000000e+00 : f32
    %195 = vector.broadcast %cst_67 : f32 to vector<1x5xf32>
    %196 = arith.subf %195, %194 : vector<1x5xf32>
    %197 = arith.mulf %186, %196 : vector<1x5xf32>
    %198 = arith.mulf %194, %188 : vector<1x5xf32>
    %199 = arith.addf %197, %198 : vector<1x5xf32>
    %cst_68 = arith.constant dense<0.000000e+00> : vector<1x384xf32>
    %200 = tpu.matmul %162, %155, %cst_68 {dimension_numbers = #tpu.dot_dimension_numbers<[1], [0], [0], [1], [0, 0, 1, 1], [], []>} : vector<1x6xf32>, vector<6x384xf32>, vector<1x384xf32> -> vector<1x384xf32>
    %cst_69 = arith.constant dense<0.000000e+00> : vector<1x384xf32>
    %201 = tpu.matmul %199, %154, %cst_69 {dimension_numbers = #tpu.dot_dimension_numbers<[1], [0], [0], [1], [0, 0, 1, 1], [], []>} : vector<1x5xf32>, vector<5x384xf32>, vector<1x384xf32> -> vector<1x384xf32>
    %202 = arith.addf %201, %200 : vector<1x384xf32>
    %203 = arith.addf %202, %156 : vector<1x384xf32>
    %204 = vector.extract_strided_slice %203 {offsets = [0, 0], sizes = [1, 6], strides = [1, 1]} : vector<1x384xf32> to vector<1x6xf32>
    %205 = math.tanh %204 : vector<1x6xf32>
    %206 = vector.extract_strided_slice %203 {offsets = [0, 128], sizes = [1, 6], strides = [1, 1]} : vector<1x384xf32> to vector<1x6xf32>
    %207 = math.tanh %206 : vector<1x6xf32>
    %208 = vector.extract_strided_slice %203 {offsets = [0, 256], sizes = [1, 6], strides = [1, 1]} : vector<1x384xf32> to vector<1x6xf32>
    %209 = arith.negf %208 : vector<1x6xf32>
    %210 = math.exp %209 : vector<1x6xf32>
    %cst_70 = arith.constant 1.000000e+00 : f32
    %211 = vector.broadcast %cst_70 : f32 to vector<1x6xf32>
    %212 = arith.addf %211, %210 : vector<1x6xf32>
    %213 = arith.divf %211, %212 : vector<1x6xf32>
    %cst_71 = arith.constant 1.000000e+00 : f32
    %214 = vector.broadcast %cst_71 : f32 to vector<1x6xf32>
    %215 = arith.subf %214, %213 : vector<1x6xf32>
    %216 = arith.mulf %205, %215 : vector<1x6xf32>
    %217 = arith.mulf %213, %207 : vector<1x6xf32>
    %218 = arith.addf %216, %217 : vector<1x6xf32>
    %cst_72 = arith.constant dense<0.000000e+00> : vector<1x384xf32>
    %219 = tpu.matmul %180, %149, %cst_72 {dimension_numbers = #tpu.dot_dimension_numbers<[1], [0], [0], [1], [0, 0, 1, 1], [], []>} : vector<1x9xf32>, vector<9x384xf32>, vector<1x384xf32> -> vector<1x384xf32>
    %220 = vector.extract_strided_slice %159 {offsets = [1, 0], sizes = [1, 384], strides = [1, 1]} : vector<2x384xf32> to vector<1x384xf32>
    %221 = arith.addf %220, %219 : vector<1x384xf32>
    %222 = vector.extract_strided_slice %221 {offsets = [0, 0], sizes = [1, 9], strides = [1, 1]} : vector<1x384xf32> to vector<1x9xf32>
    %223 = math.tanh %222 : vector<1x9xf32>
    %224 = vector.extract_strided_slice %221 {offsets = [0, 128], sizes = [1, 9], strides = [1, 1]} : vector<1x384xf32> to vector<1x9xf32>
    %225 = math.tanh %224 : vector<1x9xf32>
    %226 = vector.extract_strided_slice %221 {offsets = [0, 256], sizes = [1, 9], strides = [1, 1]} : vector<1x384xf32> to vector<1x9xf32>
    %227 = arith.negf %226 : vector<1x9xf32>
    %228 = math.exp %227 : vector<1x9xf32>
    %cst_73 = arith.constant 1.000000e+00 : f32
    %229 = vector.broadcast %cst_73 : f32 to vector<1x9xf32>
    %230 = arith.addf %229, %228 : vector<1x9xf32>
    %231 = arith.divf %229, %230 : vector<1x9xf32>
    %cst_74 = arith.constant 1.000000e+00 : f32
    %232 = vector.broadcast %cst_74 : f32 to vector<1x9xf32>
    %233 = arith.subf %232, %231 : vector<1x9xf32>
    %234 = arith.mulf %223, %233 : vector<1x9xf32>
    %235 = arith.mulf %231, %225 : vector<1x9xf32>
    %236 = arith.addf %234, %235 : vector<1x9xf32>
    %cst_75 = arith.constant dense<0.000000e+00> : vector<1x384xf32>
    %237 = tpu.matmul %199, %152, %cst_75 {dimension_numbers = #tpu.dot_dimension_numbers<[1], [0], [0], [1], [0, 0, 1, 1], [], []>} : vector<1x5xf32>, vector<5x384xf32>, vector<1x384xf32> -> vector<1x384xf32>
    %cst_76 = arith.constant dense<0.000000e+00> : vector<1x384xf32>
    %238 = tpu.matmul %236, %151, %cst_76 {dimension_numbers = #tpu.dot_dimension_numbers<[1], [0], [0], [1], [0, 0, 1, 1], [], []>} : vector<1x9xf32>, vector<9x384xf32>, vector<1x384xf32> -> vector<1x384xf32>
    %239 = arith.addf %238, %237 : vector<1x384xf32>
    %240 = arith.addf %239, %153 : vector<1x384xf32>
    %241 = vector.extract_strided_slice %240 {offsets = [0, 0], sizes = [1, 5], strides = [1, 1]} : vector<1x384xf32> to vector<1x5xf32>
    %242 = math.tanh %241 : vector<1x5xf32>
    %243 = vector.extract_strided_slice %240 {offsets = [0, 128], sizes = [1, 5], strides = [1, 1]} : vector<1x384xf32> to vector<1x5xf32>
    %244 = math.tanh %243 : vector<1x5xf32>
    %245 = vector.extract_strided_slice %240 {offsets = [0, 256], sizes = [1, 5], strides = [1, 1]} : vector<1x384xf32> to vector<1x5xf32>
    %246 = arith.negf %245 : vector<1x5xf32>
    %247 = math.exp %246 : vector<1x5xf32>
    %cst_77 = arith.constant 1.000000e+00 : f32
    %248 = vector.broadcast %cst_77 : f32 to vector<1x5xf32>
    %249 = arith.addf %248, %247 : vector<1x5xf32>
    %250 = arith.divf %248, %249 : vector<1x5xf32>
    %cst_78 = arith.constant 1.000000e+00 : f32
    %251 = vector.broadcast %cst_78 : f32 to vector<1x5xf32>
    %252 = arith.subf %251, %250 : vector<1x5xf32>
    %253 = arith.mulf %242, %252 : vector<1x5xf32>
    %254 = arith.mulf %250, %244 : vector<1x5xf32>
    %255 = arith.addf %253, %254 : vector<1x5xf32>
    %cst_79 = arith.constant dense<0.000000e+00> : vector<1x384xf32>
    %256 = tpu.matmul %218, %155, %cst_79 {dimension_numbers = #tpu.dot_dimension_numbers<[1], [0], [0], [1], [0, 0, 1, 1], [], []>} : vector<1x6xf32>, vector<6x384xf32>, vector<1x384xf32> -> vector<1x384xf32>
    %cst_80 = arith.constant dense<0.000000e+00> : vector<1x384xf32>
    %257 = tpu.matmul %255, %154, %cst_80 {dimension_numbers = #tpu.dot_dimension_numbers<[1], [0], [0], [1], [0, 0, 1, 1], [], []>} : vector<1x5xf32>, vector<5x384xf32>, vector<1x384xf32> -> vector<1x384xf32>
    %258 = arith.addf %257, %256 : vector<1x384xf32>
    %259 = arith.addf %258, %156 : vector<1x384xf32>
    %260 = vector.extract_strided_slice %259 {offsets = [0, 0], sizes = [1, 6], strides = [1, 1]} : vector<1x384xf32> to vector<1x6xf32>
    %261 = math.tanh %260 : vector<1x6xf32>
    %262 = vector.extract_strided_slice %259 {offsets = [0, 128], sizes = [1, 6], strides = [1, 1]} : vector<1x384xf32> to vector<1x6xf32>
    %263 = math.tanh %262 : vector<1x6xf32>
    %264 = vector.extract_strided_slice %259 {offsets = [0, 256], sizes = [1, 6], strides = [1, 1]} : vector<1x384xf32> to vector<1x6xf32>
    %265 = arith.negf %264 : vector<1x6xf32>
    %266 = math.exp %265 : vector<1x6xf32>
    %cst_81 = arith.constant 1.000000e+00 : f32
    %267 = vector.broadcast %cst_81 : f32 to vector<1x6xf32>
    %268 = arith.addf %267, %266 : vector<1x6xf32>
    %269 = arith.divf %267, %268 : vector<1x6xf32>
    %cst_82 = arith.constant 1.000000e+00 : f32
    %270 = vector.broadcast %cst_82 : f32 to vector<1x6xf32>
    %271 = arith.subf %270, %269 : vector<1x6xf32>
    %272 = arith.mulf %261, %271 : vector<1x6xf32>
    %273 = arith.mulf %269, %263 : vector<1x6xf32>
    %274 = arith.addf %272, %273 : vector<1x6xf32>
    %275 = tpu.concatenate %218, %274 in 0 : vector<1x6xf32>, vector<1x6xf32> -> vector<2x6xf32>
    %c0_83 = arith.constant 0 : index
    %c0_84 = arith.constant 0 : index
    %276 = vector.load %arg5[%c0_83, %c0_84] : memref<2x6xf32, #tpu.memory_space<vmem>>, vector<2x6xf32>
    tpu.vector_store %arg5[%c0_83, %c0_84], %275 {strides = array<i32>} : memref<2x6xf32, #tpu.memory_space<vmem>>, vector<2x6xf32>,
    return
  }
}

</mosaic_0001>

<bundles_post_ra>
// kernel: s4model_forward.1
= control target key start
LH: loop header
LB: loop body
LE: loop exit
PB: predicated region body
PF: predicated region fallthrough
CT: control target
= control target key end

     0   :  { %10 = vsyncpa [#allocation3], 0  ;;  %s4465_s0 = inlined_call_operand.vmem [shape: f32[2,8,12], index: 0, kind: input, shape index: {}]   ;;  %s4466_s1 = inlined_call_operand.vmem [shape: f32[2,8,8,32], index: 1, kind: input, shape index: {}]   ;;  %s4467_s2 = inlined_call_operand.vmem [shape: f32[144,32], index: 2, kind: input, shape index: {}]   ;;  %s4468_s3 = inlined_call_operand.vmem [shape: f32[11,32], index: 3, kind: input, shape index: {}]   ;;  %s4469_s4 = inlined_call_operand.hbm [shape: f32[112,384], index: 4, kind: input, shape index: {}]   ;;  %s4470_s5 = inlined_call_operand.hbm [shape: f32[2,6], index: 5, kind: output, shape index: {}]  }
   0x1   :  { %11 = vsyncpa [#allocation4], 0  ;;  %s3638_s18 = smov [#allocation2]  }
   0x2   :  { %s25_s19 = sshll.u32 %s3638_s18, 4  ;;  %s26_s19 = int_to_ptr.vmem [resolvable:$true] %s25_s19 }
   0x3   :  { %s3602_s20 = scalar_lea.vmem %s26_s19, 5376  ;;  %p3607_p1 = scmp.lt.s32.totalorder %s26_s19, %s26_s19 }
   0x4   :  { %p3603_p0 = scmp.ne.s32.totalorder %s26_s19, %s3602_s20  ;;  %p3608_p2 = scmp.lt.s32.totalorder %s3602_s20, %s3602_s20 }
   0x6   :  { %p3609_p3 = por %p3608_p2, %p3607_p1 }
   0x8   :  { %p3610_p4 = pnand %p3609_p3, %p3603_p0 }
   0xa   :  { %3613 = shalt.err (!%p3610_p4)
}
   0xb   :  { %s3639_s21 = smov 384   ;;  %s3640_s22 = smov 24  }
   0xc   :  { %31 = dma.hbm_to_vmem [thread:$0]  %s4469_s4, 5376, %s26_s19, [#allocation3], %s3639_s21, %s3639_s21, %s3640_s22  }
   0xd   :  { %3634 = dma.done.wait [#allocation3], 5376  }
   0xe   :  { %3635 = vsyncadd [#allocation3], 4294961920  ;;  %vm52_vm0 = vcmask 1043456   ;;  %vm45_vm1 = vcmask 97280   ;;  %v40_v0 = vld [vmem:[%s4467_s2 + $0x8] sm:$0xf]  ;;  %v41_v12 = vlaneseq }
   0xf   :  { %v39_v1 = vld [vmem:[%s4467_s2] sm:$0xff]  ;;  %3331 = vmatprep.subr.msk.mxu0 %vm52_vm0, %v40_v0  ;;  %v38_v3 = vld [vmem:[%s4465_s0 + $0x8] sm:$0xff]  ;;  %v467_v8 = vld [vmem:[%s4467_s2 + $0x18] sm:$0xff]  ;;  %vm155_vm2 = vcmask 261120   ;;  %vm491_vm3 = vcmask 1041409   ;;  %vm494_vm4 = vcmask 1042434  }
  0x10   :  { %v37_v2 = vld [vmem:[%s4465_s0] sm:$0xff]  ;;  %3332 = vmatpush3.msk.msra.mxu0 %vm52_vm0, %v40_v0  ;;  %v469_v4 = vld [vmem:[%s4467_s2 + $0x28] sm:$0xff]  ;;  %v605_v9 = vld [vmem:[%s4467_s2 + $0x38] sm:$0xff]  ;;  %v3713_v13 = vshrl.u32 %v41_v12, 7  ;;  %vm497_vm5 = vcmask 1043459   ;;  %vm500_vm6 = vcmask 1044484  }
  0x11   :  { %3335 = vmatprep.mubr.msk.f32.mxu0 %vm45_vm1, %v37_v2  ;;  %3333 = vmatprep.subr.mxu0 %v39_v1  ;;  %v607_v5 = vld [vmem:[%s4467_s2 + $0x48] sm:$0xff]  ;;  %v468_v6 = vld [vmem:[%s4467_s2 + $0x20] sm:$0xff]  ;;  %v466_v10 = vld [vmem:[%s4467_s2 + $0x10] sm:$0xff]  ;;  %vm503_vm7 = vcmask 1045509   ;;  %vm506_vm8 = vcmask 1046534   ;;  %vm509_vm9 = vcmask 1047559  }
  0x12   :  { %3334 = vmatpush3.msra.mxu0 %v39_v1  ;;  %3338 = vmatprep.subr.mxu1 %v469_v4  ;;  %v606_v7 = vld [vmem:[%s4467_s2 + $0x40] sm:$0xff]  ;;  %v604_v11 = vld [vmem:[%s4467_s2 + $0x30] sm:$0xff]  ;;  %v3716_v14 = vsub.s32 0, %v3713_v13  ;;  %v3724_v16 = vsub.s32 1, %v3713_v13  ;;  %v132_v22 = vld [vmem:[%s4466_s1 + $0x8] sm:$0xff]  ;;  %vm3642_vm10 = vmmov 0  }
  0x13   :  { %3336 = vmatmul.mubr.msk.f32.vlgmr.msra.gmra.mxu0 %vm45_vm1, %v38_v3  ;;  %3349 = vmatprep.subr.mxu0 %v607_v5  ;;  %v3721_v15 = vld [vmem:[%s4468_s3] sm:$0xff]  ;;  %v133_v23 = vld [vmem:[%s4466_s1 + $0x10] sm:$0xff]  ;;  %v134_v24 = vld [vmem:[%s4466_s1 + $0x18] sm:$0xff]  ;;  %vm1567_vm11 = vcmask 1040384   ;;  %vm1736_vm12 = vcmask 1044480   ;;  %vm1563_vm13 = vcmask 72704  }
  0x14   :  { %3339 = vmatpush3.msra.mxu1 %v469_v4  ;;  %3350 = vmatpush3.msra.mxu0 %v607_v5  ;;  %v44_v17 = vrot.slane %v3721_v15, %v3716_v14  ;;  %v271_v18 = vrot.slane %v3721_v15, %v3724_v16  ;;  %v131_v20 = vld [vmem:[%s4466_s1] sm:$0xff]  ;;  %v136_v29 = vld [vmem:[%s4466_s1 + $0x28] sm:$0xff]  ;;  %v3770_v34 = vld [vmem:[%s4466_s1 + $0x30] sm:$0xff]  ;;  %vm2074_vm14 = vcmask 1045504   ;;  %vm1733_vm15 = vcmask 39936  }
  0x15   :  { %3340 = vmatprep.subr.mxu1 %v468_v6  ;;  %3351 = vmatprep.subr.mxu0 %v606_v7  ;;  %v135_v26 = vld [vmem:[%s4466_s1 + $0x20] sm:$0xff]  ;;  %v3781_v39 = vld [vmem:[%s4466_s1 + $0x38] sm:$0xff]  ;;  %vm2071_vm0 = vcmask 48128   ;;  %vm3182_vm1 = vcmask 41984  }
  0x16   :  { %3341 = vmatpush3.msra.mxu1 %v468_v6  ;;  %3352 = vmatpush3.msra.mxu0 %v606_v7 }
  0x17   :  { %3342 = vmatprep.subr.mxu1 %v467_v8  ;;  %3353 = vmatprep.subr.mxu0 %v605_v9 }
  0x18   :  { %3343 = vmatpush3.msra.mxu1 %v467_v8  ;;  %3354 = vmatpush3.msra.mxu0 %v605_v9 }
  0x19   :  { %3344 = vmatprep.subr.mxu1 %v466_v10  ;;  %3355 = vmatprep.subr.mxu0 %v604_v11 }
  0x1a   :  { %3345 = vmatpush3.msra.mxu1 %v466_v10  ;;  %3356 = vmatpush3.msra.mxu0 %v604_v11 }
  0xd3   :  { %v3337_v19 = vpop.f32.mrf.mxu0 }
  0xd4   :  { %v3733_v21 = vadd.f32 %v3337_v19, %v44_v17 }
  0xd5   :  { %v122_v25 = vpop.f32.mrf.mxu0 }
  0xd6   :  { %v3748_v27 = vmul.f32 %v271_v18, %v3733_v21  ;;  %v3750_v28 = vadd.f32 %v122_v25, %v44_v17  ;;  %v3756_v30 = vmul.f32 %v131_v20, %v3733_v21  ;;  %v3759_v31 = vmul.f32 %v132_v22, %v3733_v21 }
  0xd7   :  { %v3762_v32 = vmul.f32 %v133_v23, %v3733_v21  ;;  %v3765_v33 = vmul.f32 %v134_v24, %v3733_v21  ;;  %v3776_v38 = vmul.f32 %v135_v26, %v3733_v21  ;;  %v3794_v46 = vmul.f32 %v136_v29, %v3733_v21 }
  0xd8   :  { %v139_v35 = vmul.f32 %v131_v20, %v3750_v28  ;;  %v140_v36 = vmul.f32 %v132_v22, %v3750_v28  ;;  %v141_v37 = vmul.f32 %v133_v23, %v3750_v28  ;;  %v142_v40 = vmul.f32 %v134_v24, %v3750_v28 }
  0xd9   :  { %v143_v41 = vmul.f32 %v135_v26, %v3750_v28  ;;  %v144_v42 = vmul.f32 %v136_v29, %v3750_v28  ;;  %v145_v43 = vmul.f32 %v3770_v34, %v3750_v28  ;;  %v3789_v44 = vmul.f32 %v271_v18, %v3750_v28 }
  0xda   :  { %v146_v45 = vmul.f32 %v3781_v39, %v3750_v28  ;;  %v156_v47 = vsel %vm155_vm2, %v139_v35, 0.0  ;;  %v163_v49 = vsel %vm155_vm2, %v140_v36, 0.0  ;;  %v170_v50 = vsel %vm155_vm2, %v141_v37, 0.0 }
  0xdb   :  { %v157_v48 = vrot.slane %v156_v47, 4  ;;  %v177_v51 = vsel %vm155_vm2, %v142_v40, 0.0  ;;  %v164_v52 = vrot.slane %v163_v49, 4  ;;  %v171_v53 = vrot.slane %v170_v50, 4 }
  0xdc   :  { %v178_v54 = vrot.slane %v177_v51, 4  ;;  %v184_v55 = vsel %vm155_vm2, %v143_v41, 0.0  ;;  %v191_v58 = vsel %vm155_vm2, %v144_v42, 0.0  ;;  %v198_v59 = vsel %vm155_vm2, %v145_v43, 0.0 }
  0xdd   :  { %v158_v56 = vadd.f32 %v157_v48, %v156_v47  ;;  %v185_v57 = vrot.slane %v184_v55, 4  ;;  %v165_v60 = vadd.f32 %v164_v52, %v163_v49  ;;  %v172_v61 = vadd.f32 %v171_v53, %v170_v50 }
  0xde   :  { %v179_v62 = vadd.f32 %v178_v54, %v177_v51  ;;  %v192_v63 = vrot.slane %v191_v58, 4  ;;  %v199_v2 = vrot.slane %v198_v59, 4  ;;  %v205_v3 = vsel %vm155_vm2, %v146_v45, 0.0 }
  0xdf   :  { %v159_v0 = vrot.slane %v158_v56, 2  ;;  %v186_v1 = vadd.f32 %v185_v57, %v184_v55  ;;  %v166_v4 = vrot.slane %v165_v60, 2  ;;  %v173_v5 = vrot.slane %v172_v61, 2 }
  0xe0   :  { %v180_v6 = vrot.slane %v179_v62, 2  ;;  %v193_v7 = vadd.f32 %v192_v63, %v191_v58  ;;  %v200_v10 = vadd.f32 %v199_v2, %v198_v59  ;;  %v206_v11 = vrot.slane %v205_v3, 4 }
  0xe1   :  { %v160_v8 = vadd.f32 %v159_v0, %v158_v56  ;;  %v187_v9 = vrot.slane %v186_v1, 2  ;;  %v167_v12 = vadd.f32 %v166_v4, %v165_v60  ;;  %v174_v17 = vadd.f32 %v173_v5, %v172_v61 }
  0xe2   :  { %v181_v18 = vadd.f32 %v180_v6, %v179_v62  ;;  %v194_v19 = vrot.slane %v193_v7, 2  ;;  %v201_v23 = vrot.slane %v200_v10, 2  ;;  %v207_v24 = vadd.f32 %v206_v11, %v205_v3 }
  0xe3   :  { %v161_v20 = vrot.slane %v160_v8, 1  ;;  %v188_v22 = vadd.f32 %v187_v9, %v186_v1  ;;  %v168_v25 = vrot.slane %v167_v12, 1  ;;  %v175_v26 = vrot.slane %v174_v17, 1 }
  0xe4   :  { %v182_v29 = vrot.slane %v181_v18, 1  ;;  %v195_v35 = vadd.f32 %v194_v19, %v193_v7  ;;  %v202_v40 = vadd.f32 %v201_v23, %v200_v10  ;;  %v208_v41 = vrot.slane %v207_v24, 2 }
  0xe5   :  { %v162_v36 = vadd.f32 %v161_v20, %v160_v8  ;;  %v189_v37 = vrot.slane %v188_v22, 1  ;;  %v169_v42 = vadd.f32 %v168_v25, %v167_v12  ;;  %v176_v43 = vadd.f32 %v175_v26, %v174_v17 }
  0xe6   :  { %v183_v45 = vadd.f32 %v182_v29, %v181_v18  ;;  %v196_v47 = vrot.slane %v195_v35, 1  ;;  %v203_v49 = vrot.slane %v202_v40, 1  ;;  %v209_v50 = vadd.f32 %v208_v41, %v207_v24 }
  0xe7   :  { %v190_v48 = vadd.f32 %v189_v37, %v188_v22  ;;  %v276_v51 = vrot.slane %v3789_v44, 1  ;;  %v277_v53 = vrot.slane %v3789_v44, 2  ;;  %v278_v54 = vrot.slane %v3789_v44, 3 }
  0xe8   :  { %v197_v52 = vadd.f32 %v196_v47, %v195_v35  ;;  %v279_v55 = vrot.slane %v3789_v44, 4  ;;  %v204_v56 = vadd.f32 %v203_v49, %v202_v40  ;;  %v210_v57 = vrot.slane %v209_v50, 1 }
  0xe9   :  { %v280_v58 = vrot.slane %v3789_v44, 5  ;;  %v281_v59 = vrot.slane %v3789_v44, 6  ;;  %v282_v60 = vrot.slane %v3789_v44, 7  ;;  %v306_v61 = vadd.f32 %v3789_v44, %v162_v36 }
  0xea   :  { %v307_v62 = vadd.f32 %v276_v51, %v169_v42  ;;  %v308_v63 = vadd.f32 %v277_v53, %v176_v43  ;;  %v211_v0 = vadd.f32 %v210_v57, %v209_v50  ;;  %v309_v1 = vadd.f32 %v278_v54, %v183_v45 }
  0xeb   :  { %v310_v2 = vadd.f32 %v279_v55, %v190_v48  ;;  %v311_v3 = vadd.f32 %v280_v58, %v197_v52  ;;  %v3814_v4 = vmul.f32 %v3770_v34, %v3733_v21  ;;  %v3818_v5 = vmul.f32 %v3781_v39, %v3733_v21 }
  0xec   :  { %v3820_v6 = vadd.f32 %v281_v59, %v204_v56  ;;  %v3822_v7 = vmul.f32 0.5, %v306_v61  ;;  %v3824_v8 = vadd.f32 %v282_v60, %v211_v0  ;;  %v3826_v44 = vmul.f32 0.5, %v307_v62 }
  0xed   :  { %v3828_v9 = vmul.f32 0.5, %v308_v63  ;;  %v3830_v10 = vmul.f32 0.5, %v309_v1  ;;  %v3832_v11 = vmul.f32 0.5, %v310_v2  ;;  %v338_v34 = vmul.f32 0.044715, %v306_v61 }
  0xee   :  { %v339_v12 = vmul.f32 0.044715, %v307_v62  ;;  %v212_v39 = vsel %vm155_vm2, %v3756_v30, 0.0  ;;  %v3836_v17 = vmul.f32 0.5, %v311_v3  ;;  %v340_v18 = vmul.f32 0.044715, %v308_v63 }
  0xef   :  { %v341_v19 = vmul.f32 0.044715, %v309_v1  ;;  %v213_v20 = vrot.slane %v212_v39, 4  ;;  %v342_v22 = vmul.f32 0.044715, %v310_v2  ;;  %v354_v25 = vmul.f32 %v338_v34, %v306_v61 }
  0xf0   :  { %v343_v23 = vmul.f32 0.044715, %v311_v3  ;;  %v344_v24 = vmul.f32 0.044715, %v3820_v6  ;;  %v345_v26 = vmul.f32 0.044715, %v3824_v8  ;;  %v355_v29 = vmul.f32 %v339_v12, %v307_v62 }
  0xf1   :  { %v356_v35 = vmul.f32 %v340_v18, %v308_v63  ;;  %v357_v36 = vmul.f32 %v341_v19, %v309_v1  ;;  %v358_v37 = vmul.f32 %v342_v22, %v310_v2  ;;  %v370_v30 = vmul.f32 %v354_v25, %v306_v61 }
  0xf2   :  { %v359_v40 = vmul.f32 %v343_v23, %v311_v3  ;;  %v360_v41 = vmul.f32 %v344_v24, %v3820_v6  ;;  %v361_v42 = vmul.f32 %v345_v26, %v3824_v8  ;;  %v371_v43 = vmul.f32 %v355_v29, %v307_v62 }
  0xf3   :  { %v372_v45 = vmul.f32 %v356_v35, %v308_v63  ;;  %v373_v47 = vmul.f32 %v357_v36, %v309_v1  ;;  %v374_v48 = vmul.f32 %v358_v37, %v310_v2  ;;  %v386_v51 = vadd.f32 %v370_v30, %v306_v61 }
  0xf4   :  { %v375_v49 = vmul.f32 %v359_v40, %v311_v3  ;;  %v376_v50 = vmul.f32 %v360_v41, %v3820_v6  ;;  %v377_v52 = vmul.f32 %v361_v42, %v3824_v8  ;;  %v387_v53 = vadd.f32 %v371_v43, %v307_v62 }
  0xf5   :  { %v388_v54 = vadd.f32 %v372_v45, %v308_v63  ;;  %v389_v55 = vadd.f32 %v373_v47, %v309_v1  ;;  %v390_v56 = vadd.f32 %v374_v48, %v310_v2  ;;  %v402_v59 = vmul.f32 0.7978846, %v386_v51 }
  0xf6   :  { %v391_v57 = vadd.f32 %v375_v49, %v311_v3  ;;  %v392_v58 = vadd.f32 %v376_v50, %v3820_v6  ;;  %v393_v60 = vadd.f32 %v377_v52, %v3824_v8  ;;  %v403_v0 = vmul.f32 0.7978846, %v387_v53 }
  0xf7   :  { %v404_v34 = vmul.f32 0.7978846, %v388_v54  ;;  %v405_v12 = vmul.f32 0.7978846, %v389_v55  ;;  %v406_v18 = vmul.f32 0.7978846, %v390_v56  ;;  %3457 = vtanh.f32 %v402_v59 }
  0xf8   :  { %v407_v19 = vmul.f32 0.7978846, %v391_v57  ;;  %v408_v22 = vmul.f32 0.7978846, %v392_v58  ;;  %v409_v61 = vmul.f32 0.7978846, %v393_v60  ;;  %3459 = vtanh.f32 %v403_v0 }
  0xf9   :  { %v214_v23 = vadd.f32 %v213_v20, %v212_v39  ;;  %v219_v62 = vsel %vm155_vm2, %v3759_v31, 0.0  ;;  %3461 = vtanh.f32 %v404_v34  ;;  %v226_v1 = vsel %vm155_vm2, %v3762_v32, 0.0 }
  0xfa   :  { %v220_v63 = vrot.slane %v219_v62, 4  ;;  %v233_v2 = vsel %vm155_vm2, %v3765_v33, 0.0  ;;  %3463 = vtanh.f32 %v405_v12  ;;  %v227_v24 = vrot.slane %v226_v1, 4 }
  0xfb   :  { %v215_v3 = vrot.slane %v214_v23, 2  ;;  %v234_v25 = vrot.slane %v233_v2, 4  ;;  %3465 = vtanh.f32 %v406_v18  ;;  %v240_v39 = vsel %vm155_vm2, %v3776_v38, 0.0 }
  0xfc   :  { %v221_v26 = vadd.f32 %v220_v63, %v219_v62  ;;  %v247_v31 = vsel %vm155_vm2, %v3794_v46, 0.0  ;;  %3467 = vtanh.f32 %v407_v19  ;;  %v228_v29 = vadd.f32 %v227_v24, %v226_v1 }
  0xfd   :  { %v216_v20 = vadd.f32 %v215_v3, %v214_v23  ;;  %v235_v35 = vadd.f32 %v234_v25, %v233_v2  ;;  %3469 = vtanh.f32 %v408_v22  ;;  %v241_v36 = vrot.slane %v240_v39, 4 }
  0xfe   :  { %v222_v32 = vrot.slane %v221_v26, 2  ;;  %v248_v33 = vrot.slane %v247_v31, 4  ;;  %3471 = vtanh.f32 %v409_v61  ;;  %v229_v40 = vrot.slane %v228_v29, 2 }
  0xff   :  { %v217_v37 = vrot.slane %v216_v20, 1  ;;  %v236_v41 = vrot.slane %v235_v35, 2  ;;  %v242_v42 = vadd.f32 %v241_v36, %v240_v39  ;;  %v254_v38 = vsel %vm155_vm2, %v3814_v4, 0.0 }
 0x100   :  { %v223_v30 = vadd.f32 %v222_v32, %v221_v26  ;;  %v249_v43 = vadd.f32 %v248_v33, %v247_v31  ;;  %v3859_v46 = vmul.f32 0.5, %v3820_v6  ;;  %v230_v45 = vadd.f32 %v229_v40, %v228_v29 }
 0x101   :  { %v237_v47 = vadd.f32 %v236_v41, %v235_v35  ;;  %v255_v48 = vrot.slane %v254_v38, 4  ;;  %v243_v50 = vrot.slane %v242_v42, 2  ;;  %v261_v52 = vsel %vm155_vm2, %v3818_v5, 0.0 }
 0x102   :  { %v224_v49 = vrot.slane %v223_v30, 1  ;;  %v250_v51 = vrot.slane %v249_v43, 2  ;;  %v231_v53 = vrot.slane %v230_v45, 1  ;;  %v262_v56 = vrot.slane %v261_v52, 4 }
 0x103   :  { %v238_v54 = vrot.slane %v237_v47, 1  ;;  %v256_v55 = vadd.f32 %v255_v48, %v254_v38  ;;  %v329_v57 = vmul.f32 0.5, %v3824_v8  ;;  %v3864_v4 = vadd.f32 %v217_v37, %v216_v20 }
 0x104   :  { %v244_v6 = vadd.f32 %v243_v50, %v242_v42  ;;  %v251_v58 = vadd.f32 %v250_v51, %v249_v43  ;;  %v3458_v59 = vpop.eup %3457  ;;  %v3866_v60 = vadd.f32 %v224_v49, %v223_v30  ;;  %v263_v34 = vadd.f32 %v262_v56, %v261_v52 }
 0x105   :  { %v257_v0 = vrot.slane %v256_v55, 2  ;;  %v283_v12 = vrot.slane %v3748_v27, 1  ;;  %v3460_v5 = vpop.eup %3459  ;;  %v434_v18 = vadd.f32 1.0, %v3458_v59  ;;  %v232_v19 = vadd.f32 %v231_v53, %v230_v45 }
 0x106   :  { %v245_v22 = vrot.slane %v244_v6, 1  ;;  %v252_v61 = vrot.slane %v251_v58, 1  ;;  %v3462_v8 = vpop.eup %3461  ;;  %v435_v23 = vadd.f32 1.0, %v3460_v5  ;;  %v239_v62 = vadd.f32 %v238_v54, %v237_v47 }
 0x107   :  { %v258_v63 = vadd.f32 %v257_v0, %v256_v55  ;;  %v264_v1 = vrot.slane %v263_v34, 2  ;;  %v3464_v2 = vpop.eup %3463  ;;  %v436_v3 = vadd.f32 1.0, %v3462_v8  ;;  %v450_v24 = vmul.f32 %v434_v18, %v3822_v7 }
 0x108   :  { %v284_v25 = vrot.slane %v3748_v27, 2  ;;  %v285_v26 = vrot.slane %v3748_v27, 3  ;;  %v3466_v39 = vpop.eup %3465  ;;  %v437_v31 = vadd.f32 1.0, %v3464_v2  ;;  %v451_v20 = vmul.f32 %v435_v23, %v3826_v44 }
 0x109   :  { %v246_v29 = vadd.f32 %v245_v22, %v244_v6  ;;  %v265_v35 = vadd.f32 %v264_v1, %v263_v34  ;;  %v3468_v32 = vpop.eup %3467  ;;  %v438_v36 = vadd.f32 1.0, %v3466_v39  ;;  %v452_v33 = vmul.f32 %v436_v3, %v3828_v9 }
 0x10a   :  { %v253_v37 = vadd.f32 %v252_v61, %v251_v58  ;;  %v259_v40 = vrot.slane %v258_v63, 1  ;;  %v3470_v7 = vpop.eup %3469  ;;  %v439_v41 = vadd.f32 1.0, %v3468_v32  ;;  %v453_v30 = vmul.f32 %v437_v31, %v3830_v10 }
 0x10b   :  { %v490_v42 = vrot.slane %v451_v20, 7  ;;  %v286_v43 = vrot.slane %v3748_v27, 4  ;;  %v3472_v38 = vpop.eup %3471  ;;  %v440_v45 = vadd.f32 1.0, %v3470_v7  ;;  %v454_v44 = vmul.f32 %v438_v36, %v3832_v11 }
 0x10c   :  { %v493_v47 = vrot.slane %v452_v33, 6  ;;  %v266_v48 = vrot.slane %v265_v35, 1  ;;  %v441_v49 = vadd.f32 1.0, %v3472_v38  ;;  %v455_v50 = vmul.f32 %v439_v41, %v3836_v17 }
 0x10d   :  { %v492_v9 = vsel %vm491_vm3, %v490_v42, %v450_v24  ;;  %v496_v51 = vrot.slane %v453_v30, 5  ;;  %v456_v52 = vmul.f32 %v440_v45, %v3859_v46  ;;  %v499_v10 = vrot.slane %v454_v44, 4 }
 0x10e   :  { %v495_v53 = vsel %vm494_vm4, %v493_v47, %v492_v9  ;;  %v287_v54 = vrot.slane %v3748_v27, 5  ;;  %v457_v55 = vmul.f32 %v441_v49, %v329_v57  ;;  %v502_v6 = vrot.slane %v455_v50, 3 }
 0x10f   :  { %v498_v56 = vsel %vm497_vm5, %v496_v51, %v495_v53  ;;  %v260_v11 = vadd.f32 %v259_v40, %v258_v63  ;;  %v505_v59 = vrot.slane %v456_v52, 2  ;;  %v267_v0 = vadd.f32 %v266_v48, %v265_v35 }
 0x110   :  { %v501_v58 = vsel %vm500_vm6, %v499_v10, %v498_v56  ;;  %v288_v17 = vrot.slane %v3748_v27, 6  ;;  %v508_v5 = vrot.slane %v457_v55, 1  ;;  %v289_v46 = vrot.slane %v3748_v27, 7 }
 0x111   :  { %v504_v34 = vsel %vm503_vm7, %v502_v6, %v501_v58  ;;  %v3889_v18 = vadd.f32 %v3748_v27, %v3864_v4  ;;  %v315_v22 = vadd.f32 %v283_v12, %v3866_v60  ;;  %v3895_v61 = vadd.f32 %v284_v25, %v232_v19 }
 0x112   :  { %v507_v57 = vsel %vm506_vm8, %v505_v59, %v504_v34  ;;  %v3897_v8 = vadd.f32 %v285_v26, %v239_v62  ;;  %v3900_v63 = vadd.f32 %v286_v43, %v246_v29  ;;  %v3902_v1 = vadd.f32 %v287_v54, %v253_v37 }
 0x113   :  { %v510_v23 = vsel %vm509_vm9, %v508_v5, %v507_v57  ;;  %v3904_v2 = vadd.f32 %v288_v17, %v260_v11  ;;  %v3908_v4 = vadd.f32 %v289_v46, %v267_v0  ;;  %v346_v27 = vmul.f32 0.044715, %v3889_v18 }
 0x114   :  { %3346 = vmatprep.mubr.msk.f32.mxu1 %vm155_vm2, %v510_v23  ;;  %3357 = vmatprep.mubr.msk.f32.mxu0 %vm155_vm2, %v510_v23  ;;  %v347_v60 = vmul.f32 0.044715, %v315_v22  ;;  %v348_v12 = vmul.f32 0.044715, %v3895_v61  ;;  %v349_v19 = vmul.f32 0.044715, %v3897_v8 }
 0x115   :  { %v350_v62 = vmul.f32 0.044715, %v3900_v63  ;;  %v351_v3 = vmul.f32 0.044715, %v3902_v1  ;;  %v352_v24 = vmul.f32 0.044715, %v3904_v2  ;;  %v362_v25 = vmul.f32 %v346_v27, %v3889_v18 }
 0x116   :  { %v353_v26 = vmul.f32 0.044715, %v3908_v4  ;;  %v363_v39 = vmul.f32 %v347_v60, %v315_v22  ;;  %v364_v31 = vmul.f32 %v348_v12, %v3895_v61  ;;  %v365_v20 = vmul.f32 %v349_v19, %v3897_v8 }
 0x117   :  { %v366_v29 = vmul.f32 %v350_v62, %v3900_v63  ;;  %v367_v35 = vmul.f32 %v351_v3, %v3902_v1  ;;  %v368_v32 = vmul.f32 %v352_v24, %v3904_v2  ;;  %v378_v36 = vmul.f32 %v362_v25, %v3889_v18 }
 0x118   :  { %v369_v33 = vmul.f32 %v353_v26, %v3908_v4  ;;  %v379_v37 = vmul.f32 %v363_v39, %v315_v22  ;;  %v380_v40 = vmul.f32 %v364_v31, %v3895_v61  ;;  %v381_v7 = vmul.f32 %v365_v20, %v3897_v8 }
 0x119   :  { %v382_v41 = vmul.f32 %v366_v29, %v3900_v63  ;;  %v383_v30 = vmul.f32 %v367_v35, %v3902_v1  ;;  %v384_v42 = vmul.f32 %v368_v32, %v3904_v2  ;;  %v394_v43 = vadd.f32 %v378_v36, %v3889_v18 }
 0x11a   :  { %v385_v38 = vmul.f32 %v369_v33, %v3908_v4  ;;  %v395_v45 = vadd.f32 %v379_v37, %v315_v22  ;;  %v396_v44 = vadd.f32 %v380_v40, %v3895_v61  ;;  %v397_v47 = vadd.f32 %v381_v7, %v3897_v8 }
 0x11b   :  { %v398_v48 = vadd.f32 %v382_v41, %v3900_v63  ;;  %v399_v49 = vadd.f32 %v383_v30, %v3902_v1  ;;  %v400_v50 = vadd.f32 %v384_v42, %v3904_v2  ;;  %v410_v9 = vmul.f32 0.7978846, %v394_v43 }
 0x11c   :  { %v401_v51 = vadd.f32 %v385_v38, %v3908_v4  ;;  %v411_v52 = vmul.f32 0.7978846, %v395_v45  ;;  %v412_v53 = vmul.f32 0.7978846, %v396_v44  ;;  %v413_v10 = vmul.f32 0.7978846, %v397_v47 }
 0x11d   :  { %v414_v54 = vmul.f32 0.7978846, %v398_v48  ;;  %3473 = vtanh.f32 %v410_v9  ;;  %v415_v55 = vmul.f32 0.7978846, %v399_v49  ;;  %v416_v56 = vmul.f32 0.7978846, %v400_v50 }
 0x11e   :  { %3475 = vtanh.f32 %v411_v52  ;;  %v417_v6 = vmul.f32 0.7978846, %v401_v51  ;;  %v331_v0 = vmul.f32 0.5, %v315_v22  ;;  %v330_v46 = vmul.f32 0.5, %v3889_v18 }
 0x11f   :  { %3477 = vtanh.f32 %v412_v53  ;;  %v332_v57 = vmul.f32 0.5, %v3895_v61  ;;  %v333_v60 = vmul.f32 0.5, %v3897_v8  ;;  %v334_v12 = vmul.f32 0.5, %v3900_v63 }
 0x120   :  { %3479 = vtanh.f32 %v413_v10  ;;  %v335_v24 = vmul.f32 0.5, %v3902_v1  ;;  %v336_v22 = vmul.f32 0.5, %v3904_v2  ;;  %v337_v35 = vmul.f32 0.5, %v3908_v4 }
 0x121   :  { %3481 = vtanh.f32 %v414_v54  ;;  %v610_v48 = vsub.s32 5, %v3713_v13 }
 0x122   :  { %3483 = vtanh.f32 %v415_v55 }
 0x123   :  { %3485 = vtanh.f32 %v416_v56  ;;  %v611_v49 = vrot.slane %v3721_v15, %v610_v48  ;;  %v3210_v48 = vld [vmem:[%s4466_s1 + $0x50] sm:$0xff] }
 0x124   :  { %3487 = vtanh.f32 %v417_v6 }
 0x12a   :  { %v3474_v11 = vpop.eup %3473 }
 0x12b   :  { %v3476_v58 = vpop.eup %3475  ;;  %v442_v17 = vadd.f32 1.0, %v3474_v11  ;;  %v472_v11 = vsub.s32 4, %v3713_v13 }
 0x12c   :  { %v3478_v59 = vpop.eup %3477  ;;  %v443_v34 = vadd.f32 1.0, %v3476_v58 }
 0x12d   :  { %v3480_v5 = vpop.eup %3479  ;;  %v444_v23 = vadd.f32 1.0, %v3478_v59  ;;  %v458_v18 = vmul.f32 %v442_v17, %v330_v46  ;;  %v473_v59 = vrot.slane %v3721_v15, %v472_v11 }
 0x12e   :  { %v3482_v27 = vpop.eup %3481  ;;  %v445_v19 = vadd.f32 1.0, %v3480_v5  ;;  %v459_v62 = vmul.f32 %v443_v34, %v331_v0 }
 0x12f   :  { %v3484_v3 = vpop.eup %3483  ;;  %v446_v25 = vadd.f32 1.0, %v3482_v27  ;;  %v460_v26 = vmul.f32 %v444_v23, %v332_v57 }
 0x130   :  { %v3486_v39 = vpop.eup %3485  ;;  %v447_v31 = vadd.f32 1.0, %v3484_v3  ;;  %v461_v20 = vmul.f32 %v445_v19, %v333_v60  ;;  %v511_v61 = vrot.slane %v459_v62, 7 }
 0x131   :  { %v3488_v29 = vpop.eup %3487  ;;  %v448_v8 = vadd.f32 1.0, %v3486_v39  ;;  %v462_v32 = vmul.f32 %v446_v25, %v334_v12  ;;  %v513_v63 = vrot.slane %v460_v26, 6 }
 0x132   :  { %v449_v36 = vadd.f32 1.0, %v3488_v29  ;;  %v463_v33 = vmul.f32 %v447_v31, %v335_v24  ;;  %v512_v37 = vsel %vm491_vm3, %v511_v61, %v458_v18  ;;  %v515_v1 = vrot.slane %v461_v20, 5  ;;  %v1211_v20 = vld [vmem:[%s4467_s2 + $0x88] sm:$0xff]  ;;  %v1079_v61 = vld [vmem:[%s4467_s2 + $0x60] sm:$0xff] }
 0x133   :  { %v464_v40 = vmul.f32 %v448_v8, %v336_v22  ;;  %v514_v2 = vsel %vm494_vm4, %v513_v63, %v512_v37  ;;  %v517_v7 = vrot.slane %v462_v32, 4  ;;  %3371 = vmatprep.subr.mxu0 %v1211_v20  ;;  %v1210_v29 = vld [vmem:[%s4467_s2 + $0x80] sm:$0xff]  ;;  %v1209_v8 = vld [vmem:[%s4467_s2 + $0x78] sm:$0xff]  ;;  %v1077_v32 = vld [vmem:[%s4467_s2 + $0x50] sm:$0xff] }
 0x134   :  { %v465_v41 = vmul.f32 %v449_v36, %v337_v35  ;;  %v516_v30 = vsel %vm497_vm5, %v515_v1, %v514_v2  ;;  %v519_v42 = vrot.slane %v463_v33, 3  ;;  %v1078_v35 = vld [vmem:[%s4467_s2 + $0x58] sm:$0xff]  ;;  %v1208_v63 = vld [vmem:[%s4467_s2 + $0x70] sm:$0xff] }
 0x135   :  { %v518_v43 = vsel %vm500_vm6, %v517_v7, %v516_v30  ;;  %v521_v38 = vrot.slane %v464_v40, 2  ;;  %v3989_v7 = vsub.s32 2, %v3713_v13 }
 0x136   :  { %v520_v4 = vsel %vm503_vm7, %v519_v42, %v518_v43  ;;  %v523_v45 = vrot.slane %v465_v41, 1  ;;  %v738_v41 = vsub.s32 3, %v3713_v13 }
 0x137   :  { %v522_v44 = vsel %vm506_vm8, %v521_v38, %v520_v4  ;;  %v733_v30 = vrot.slane %v3721_v15, %v3989_v7 }
 0x138   :  { %v524_v47 = vsel %vm509_vm9, %v523_v45, %v522_v44  ;;  %v739_v43 = vrot.slane %v3721_v15, %v738_v41  ;;  %v3208_v45 = vld [vmem:[%s4466_s1 + $0x40] sm:$0xff] }
 0x139   :  { %3347 = vmatmul.mubr.msk.f32.vlgmr.msra.gmra.mxu1 %vm155_vm2, %v524_v47  ;;  %3358 = vmatmul.mubr.msk.f32.vlgmr.msra.gmra.mxu0 %vm155_vm2, %v524_v47  ;;  %v3209_v47 = vld [vmem:[%s4466_s1 + $0x48] sm:$0xff] }
 0x13a   :  { %3372 = vmatpush3.msra.mxu0 %v1211_v20 }
 0x13b   :  { %3373 = vmatprep.subr.mxu0 %v1210_v29 }
 0x13c   :  { %3374 = vmatpush3.msra.mxu0 %v1210_v29 }
 0x13d   :  { %3375 = vmatprep.subr.mxu0 %v1209_v8 }
 0x13e   :  { %3376 = vmatpush3.msra.mxu0 %v1209_v8 }
 0x13f   :  { %3377 = vmatprep.subr.mxu0 %v1208_v63 }
 0x140   :  { %3378 = vmatpush3.msra.mxu0 %v1208_v63 }
 0x1f9   :  { %v3359_v50 = vpop.f32.mrf.mxu0  ;;  %v3348_v58 = vpop.f32.mrf.mxu1 }
 0x1fa   :  { %v684_v9 = vadd.f32 %v3359_v50, %v611_v49  ;;  %v601_v34 = vadd.f32 %v3348_v58, %v473_v59 }
 0x1fb   :  { %v678_v51 = vpop.f32.mrf.mxu0  ;;  %v595_v0 = vpop.f32.mrf.mxu1 }
 0x1fc   :  { %v3207_v52 = vmul.f32 -1.442695, %v684_v9  ;;  %v679_v53 = vadd.f32 %v678_v51, %v611_v49  ;;  %v596_v5 = vadd.f32 %v595_v0, %v473_v59  ;;  %v3211_v49 = vld [vmem:[%s4466_s1 + $0x58] sm:$0xff]  ;;  %v3212_v51 = vld [vmem:[%s4466_s1 + $0x60] sm:$0xff] }
 0x1fe   :  { %3489 = vpow2.f32 %v3207_v52  ;;  %v3206_v10 = vmul.f32 -1.442695, %v679_v53  ;;  %v3213_v52 = vld [vmem:[%s4466_s1 + $0x68] sm:$0xff]  ;;  %v3214_v53 = vld [vmem:[%s4466_s1 + $0x70] sm:$0xff] }
 0x200   :  { %3491 = vpow2.f32 %v3206_v10  ;;  %v881_v10 = vsub.s32 6, %v3713_v13 }
 0x20b   :  { %v3490_v54 = vpop.eup %3489 }
 0x20c   :  { %v694_v55 = vadd.f32 1.0, %v3490_v54  ;;  %v4022_v54 = vld [vmem:[%s4466_s1 + $0x78] sm:$0xff] }
 0x20d   :  { %v3492_v56 = vpop.eup %3491 }
 0x20e   :  { %3493 = vrcp.f32 %v694_v55  ;;  %v693_v6 = vadd.f32 1.0, %v3492_v56 }
 0x210   :  { %3495 = vrcp.f32 %v693_v6 }
 0x21b   :  { %v3494_v17 = vpop.eup %3493 }
 0x21c   :  { %v700_v23 = vmul.f32 %v3494_v17, %v601_v34 }
 0x21d   :  { %v3496_v46 = vpop.eup %3495 }
 0x21e   :  { %v699_v57 = vmul.f32 %v3496_v46, %v596_v5  ;;  %v702_v12 = vadd.f32 %v700_v23, %v3733_v21  ;;  %v1080_v21 = vld [vmem:[%s4467_s2 + $0x68] sm:$0xff] }
 0x21f   :  { %3360 = vmatprep.subr.mxu1 %v1080_v21 }
 0x220   :  { %v701_v27 = vadd.f32 %v699_v57, %v3750_v28  ;;  %v706_v19 = vsel %vm155_vm2, %v702_v12, 0.0  ;;  %3361 = vmatpush3.msra.mxu1 %v1080_v21 }
 0x221   :  { %3362 = vmatprep.subr.mxu1 %v1079_v61 }
 0x222   :  { %v703_v60 = vsel %vm155_vm2, %v701_v27, 0.0  ;;  %3363 = vmatpush3.msra.mxu1 %v1079_v61 }
 0x223   :  { %704 = vadd.xlane.f32.xlu0 %v703_v60  ;;  %3364 = vmatprep.subr.mxu1 %v1078_v35 }
 0x224   :  { %3365 = vmatpush3.msra.mxu1 %v1078_v35 }
 0x225   :  { %3366 = vmatprep.subr.mxu1 %v1077_v32 }
 0x226   :  { %3367 = vmatpush3.msra.mxu1 %v1077_v32 }
 0x227   :  { %707 = vadd.xlane.f32.xlu0 %v706_v19  ;;  %v4040_v19 = vrot.slane %v3721_v15, %v881_v10 }
 0x2ac   :  { %v705_v62 = vpop.xlane.xlu0 %704 }
 0x2ad   :  { %v710_v3 = vmul.f32 0.03125, %v705_v62 }
 0x2af   :  { %v712_v24 = vsub.f32 %v701_v27, %v710_v3 }
 0x2b0   :  { %v708_v22 = vpop.xlane.xlu0 %707 }
 0x2b1   :  { %v711_v25 = vmul.f32 0.03125, %v708_v22  ;;  %v714_v26 = vmul.f32 %v712_v24, %v712_v24 }
 0x2b3   :  { %v713_v39 = vsub.f32 %v702_v12, %v711_v25  ;;  %v716_v31 = vsel %vm155_vm2, %v714_v26, 0.0 }
 0x2b4   :  { %717 = vadd.xlane.f32.xlu1 %v716_v31 }
 0x2b5   :  { %v715_v18 = vmul.f32 %v713_v39, %v713_v39 }
 0x2b7   :  { %v719_v28 = vsel %vm155_vm2, %v715_v18, 0.0 }
 0x2b8   :  { %720 = vadd.xlane.f32.xlu1 %v719_v28 }
 0x33d   :  { %v718_v36 = vpop.xlane.xlu1 %717 }
 0x33e   :  { %v722_v33 = vmul.f32 0.03125, %v718_v36 }
 0x340   :  { %v724_v37 = vadd.f32 1e-05, %v722_v33 }
 0x341   :  { %v721_v1 = vpop.xlane.xlu1 %720 }
 0x342   :  { %3497 = vrsqrt.f32 %v724_v37  ;;  %v723_v40 = vmul.f32 0.03125, %v721_v1 }
 0x344   :  { %v725_v2 = vadd.f32 1e-05, %v723_v40 }
 0x346   :  { %3499 = vrsqrt.f32 %v725_v2 }
 0x34f   :  { %v3498_v42 = vpop.eup %3497 }
 0x350   :  { %v728_v38 = vmul.f32 %v3498_v42, %v712_v24 }
 0x352   :  { %v734_v4 = vmul.f32 %v733_v30, %v728_v38 }
 0x353   :  { %v3500_v44 = vpop.eup %3499 }
 0x354   :  { %v4007_v50 = vadd.f32 %v739_v43, %v734_v4  ;;  %v729_v9 = vmul.f32 %v3500_v44, %v713_v39 }
 0x356   :  { %v735_v55 = vmul.f32 %v733_v30, %v729_v9  ;;  %v751_v56 = vmul.f32 %v3208_v45, %v4007_v50  ;;  %v752_v6 = vmul.f32 %v3209_v47, %v4007_v50  ;;  %v753_v11 = vmul.f32 %v3210_v48, %v4007_v50 }
 0x357   :  { %v754_v58 = vmul.f32 %v3211_v49, %v4007_v50  ;;  %v755_v59 = vmul.f32 %v3212_v51, %v4007_v50  ;;  %v756_v0 = vmul.f32 %v3213_v52, %v4007_v50  ;;  %v757_v17 = vmul.f32 %v3214_v53, %v4007_v50 }
 0x358   :  { %v4031_v34 = vadd.f32 %v739_v43, %v735_v55  ;;  %v758_v5 = vmul.f32 %v4022_v54, %v4007_v50  ;;  %v767_v46 = vsel %vm155_vm2, %v751_v56, 0.0  ;;  %v774_v57 = vsel %vm155_vm2, %v752_v6, 0.0 }
 0x359   :  { %v768_v23 = vrot.slane %v767_v46, 4  ;;  %v775_v27 = vrot.slane %v774_v57, 4  ;;  %v781_v60 = vsel %vm155_vm2, %v753_v11, 0.0  ;;  %v788_v12 = vsel %vm155_vm2, %v754_v58, 0.0 }
 0x35a   :  { %v4043_v62 = vmul.f32 %v3208_v45, %v4031_v34  ;;  %v4046_v3 = vmul.f32 %v3209_v47, %v4031_v34  ;;  %v4049_v24 = vmul.f32 %v3210_v48, %v4031_v34  ;;  %v4052_v22 = vmul.f32 %v3211_v49, %v4031_v34 }
 0x35b   :  { %v4055_v25 = vmul.f32 %v3212_v51, %v4031_v34  ;;  %v4058_v26 = vmul.f32 %v3213_v52, %v4031_v34  ;;  %v769_v15 = vadd.f32 %v768_v23, %v767_v46  ;;  %v776_v39 = vadd.f32 %v775_v27, %v774_v57 }
 0x35c   :  { %v782_v31 = vrot.slane %v781_v60, 4  ;;  %v789_v18 = vrot.slane %v788_v12, 4  ;;  %v795_v28 = vsel %vm155_vm2, %v755_v59, 0.0  ;;  %v802_v21 = vsel %vm155_vm2, %v756_v0, 0.0 }
 0x35d   :  { %v809_v20 = vsel %vm155_vm2, %v757_v17, 0.0  ;;  %v816_v61 = vsel %vm155_vm2, %v758_v5, 0.0  ;;  %v770_v29 = vrot.slane %v769_v15, 2  ;;  %v777_v35 = vrot.slane %v776_v39, 2 }
 0x35e   :  { %v783_v8 = vadd.f32 %v782_v31, %v781_v60  ;;  %v790_v32 = vadd.f32 %v789_v18, %v788_v12  ;;  %v796_v63 = vrot.slane %v795_v28, 4  ;;  %v803_v36 = vrot.slane %v802_v21, 4 }
 0x35f   :  { %v810_v33 = vrot.slane %v809_v20, 4  ;;  %v817_v37 = vrot.slane %v816_v61, 4  ;;  %v771_v1 = vadd.f32 %v770_v29, %v769_v15  ;;  %v778_v40 = vadd.f32 %v777_v35, %v776_v39 }
 0x360   :  { %v784_v2 = vrot.slane %v783_v8, 2  ;;  %v791_v41 = vrot.slane %v790_v32, 2  ;;  %v797_v30 = vadd.f32 %v796_v63, %v795_v28  ;;  %v804_v42 = vadd.f32 %v803_v36, %v802_v21 }
 0x361   :  { %v811_v43 = vadd.f32 %v810_v33, %v809_v20  ;;  %v818_v38 = vadd.f32 %v817_v37, %v816_v61  ;;  %v772_v4 = vrot.slane %v771_v1, 1  ;;  %v779_v45 = vrot.slane %v778_v40, 1 }
 0x362   :  { %v785_v44 = vadd.f32 %v784_v2, %v783_v8  ;;  %v792_v47 = vadd.f32 %v791_v41, %v790_v32  ;;  %v798_v48 = vrot.slane %v797_v30, 2  ;;  %v805_v49 = vrot.slane %v804_v42, 2 }
 0x363   :  { %v812_v9 = vrot.slane %v811_v43, 2  ;;  %v819_v51 = vrot.slane %v818_v38, 2  ;;  %v4065_v52 = vmul.f32 %v3214_v53, %v4031_v34  ;;  %v773_v10 = vadd.f32 %v772_v4, %v771_v1 }
 0x364   :  { %v786_v55 = vrot.slane %v785_v44, 1  ;;  %v793_v56 = vrot.slane %v792_v47, 1  ;;  %v799_v6 = vadd.f32 %v798_v48, %v797_v30  ;;  %v806_v11 = vadd.f32 %v805_v49, %v804_v42 }
 0x365   :  { %v813_v58 = vadd.f32 %v812_v9, %v811_v43  ;;  %v820_v59 = vadd.f32 %v819_v51, %v818_v38  ;;  %v780_v0 = vadd.f32 %v779_v45, %v778_v40  ;;  %v883_v46 = vmul.f32 %v4040_v19, %v4007_v50 }
 0x366   :  { %v787_v17 = vadd.f32 %v786_v55, %v785_v44  ;;  %v794_v5 = vadd.f32 %v793_v56, %v792_v47  ;;  %v800_v57 = vrot.slane %v799_v6, 1  ;;  %v807_v23 = vrot.slane %v806_v11, 1 }
 0x367   :  { %v814_v27 = vrot.slane %v813_v58, 1  ;;  %v821_v60 = vrot.slane %v820_v59, 1  ;;  %v887_v12 = vrot.slane %v883_v46, 1  ;;  %v888_v53 = vrot.slane %v883_v46, 2 }
 0x368   :  { %v889_v15 = vrot.slane %v883_v46, 3  ;;  %v890_v39 = vrot.slane %v883_v46, 4  ;;  %v801_v31 = vadd.f32 %v800_v57, %v799_v6  ;;  %v808_v18 = vadd.f32 %v807_v23, %v806_v11 }
 0x369   :  { %v815_v28 = vadd.f32 %v814_v27, %v813_v58  ;;  %v822_v21 = vadd.f32 %v821_v60, %v820_v59  ;;  %v891_v20 = vrot.slane %v883_v46, 5  ;;  %v892_v61 = vrot.slane %v883_v46, 6 }
 0x36a   :  { %v893_v29 = vrot.slane %v883_v46, 7  ;;  %v917_v35 = vadd.f32 %v883_v46, %v773_v10  ;;  %v918_v8 = vadd.f32 %v887_v12, %v780_v0  ;;  %v919_v32 = vadd.f32 %v888_v53, %v787_v17 }
 0x36b   :  { %v920_v63 = vadd.f32 %v889_v15, %v794_v5  ;;  %v921_v36 = vadd.f32 %v890_v39, %v801_v31  ;;  %v922_v33 = vadd.f32 %v891_v20, %v808_v18  ;;  %v923_v37 = vadd.f32 %v892_v61, %v815_v28 }
 0x36c   :  { %v4069_v1 = vadd.f32 %v893_v29, %v822_v21  ;;  %v823_v40 = vsel %vm155_vm2, %v4043_v62, 0.0  ;;  %v4073_v2 = vmul.f32 0.5, %v917_v35  ;;  %v4075_v41 = vmul.f32 0.5, %v918_v8 }
 0x36d   :  { %v4077_v30 = vmul.f32 0.5, %v919_v32  ;;  %v4079_v42 = vmul.f32 0.5, %v920_v63  ;;  %v4081_v43 = vmul.f32 0.5, %v921_v36  ;;  %v4083_v38 = vmul.f32 0.5, %v922_v33 }
 0x36e   :  { %v4085_v4 = vmul.f32 0.5, %v923_v37  ;;  %v949_v45 = vmul.f32 0.044715, %v917_v35  ;;  %v4089_v44 = vmul.f32 %v4022_v54, %v4031_v34  ;;  %v950_v62 = vmul.f32 0.044715, %v918_v8 }
 0x36f   :  { %v951_v47 = vmul.f32 0.044715, %v919_v32  ;;  %v952_v48 = vmul.f32 0.044715, %v920_v63  ;;  %v953_v49 = vmul.f32 0.044715, %v921_v36 }
 0x370   :  { %v954_v9 = vmul.f32 0.044715, %v922_v33  ;;  %v955_v51 = vmul.f32 0.044715, %v923_v37  ;;  %v965_v10 = vmul.f32 %v949_v45, %v917_v35  ;;  %v956_v55 = vmul.f32 0.044715, %v4069_v1 }
 0x371   :  { %v966_v56 = vmul.f32 %v950_v62, %v918_v8  ;;  %v967_v6 = vmul.f32 %v951_v47, %v919_v32  ;;  %v968_v11 = vmul.f32 %v952_v48, %v920_v63  ;;  %v969_v58 = vmul.f32 %v953_v49, %v921_v36 }
 0x372   :  { %v970_v59 = vmul.f32 %v954_v9, %v922_v33  ;;  %v971_v0 = vmul.f32 %v955_v51, %v923_v37  ;;  %v981_v17 = vmul.f32 %v965_v10, %v917_v35  ;;  %v972_v5 = vmul.f32 %v956_v55, %v4069_v1 }
 0x373   :  { %v982_v54 = vmul.f32 %v966_v56, %v918_v8  ;;  %v983_v46 = vmul.f32 %v967_v6, %v919_v32  ;;  %v984_v57 = vmul.f32 %v968_v11, %v920_v63  ;;  %v985_v23 = vmul.f32 %v969_v58, %v921_v36 }
 0x374   :  { %v986_v27 = vmul.f32 %v970_v59, %v922_v33  ;;  %v987_v60 = vmul.f32 %v971_v0, %v923_v37  ;;  %v997_v12 = vadd.f32 %v981_v17, %v917_v35  ;;  %v988_v53 = vmul.f32 %v972_v5, %v4069_v1 }
 0x375   :  { %v998_v15 = vadd.f32 %v982_v54, %v918_v8  ;;  %v999_v39 = vadd.f32 %v983_v46, %v919_v32  ;;  %v1000_v31 = vadd.f32 %v984_v57, %v920_v63  ;;  %v1001_v18 = vadd.f32 %v985_v23, %v921_v36 }
 0x376   :  { %v1002_v28 = vadd.f32 %v986_v27, %v922_v33  ;;  %v1003_v21 = vadd.f32 %v987_v60, %v923_v37  ;;  %v1013_v20 = vmul.f32 0.7978846, %v997_v12  ;;  %v1004_v61 = vadd.f32 %v988_v53, %v4069_v1 }
 0x377   :  { %v1014_v29 = vmul.f32 0.7978846, %v998_v15  ;;  %v1015_v45 = vmul.f32 0.7978846, %v999_v39  ;;  %v1016_v62 = vmul.f32 0.7978846, %v1000_v31 }
 0x378   :  { %v1017_v47 = vmul.f32 0.7978846, %v1001_v18  ;;  %v1018_v48 = vmul.f32 0.7978846, %v1002_v28  ;;  %v1019_v49 = vmul.f32 0.7978846, %v1003_v21  ;;  %3501 = vtanh.f32 %v1013_v20 }
 0x379   :  { %v1020_v9 = vmul.f32 0.7978846, %v1004_v61  ;;  %3503 = vtanh.f32 %v1014_v29  ;;  %v824_v35 = vrot.slane %v823_v40, 4  ;;  %v830_v8 = vsel %vm155_vm2, %v4046_v3, 0.0 }
 0x37a   :  { %3505 = vtanh.f32 %v1015_v45  ;;  %v831_v32 = vrot.slane %v830_v8, 4  ;;  %v837_v63 = vsel %vm155_vm2, %v4049_v24, 0.0  ;;  %v844_v36 = vsel %vm155_vm2, %v4052_v22, 0.0 }
 0x37b   :  { %3507 = vtanh.f32 %v1016_v62  ;;  %v825_v33 = vadd.f32 %v824_v35, %v823_v40  ;;  %v838_v37 = vrot.slane %v837_v63, 4  ;;  %v845_v51 = vrot.slane %v844_v36, 4 }
 0x37c   :  { %3509 = vtanh.f32 %v1017_v47  ;;  %v832_v10 = vadd.f32 %v831_v32, %v830_v8  ;;  %v851_v55 = vsel %vm155_vm2, %v4055_v25, 0.0  ;;  %v858_v3 = vsel %vm155_vm2, %v4058_v26, 0.0 }
 0x37d   :  { %3511 = vtanh.f32 %v1018_v48  ;;  %v826_v56 = vrot.slane %v825_v33, 2  ;;  %v839_v6 = vadd.f32 %v838_v37, %v837_v63  ;;  %v846_v11 = vadd.f32 %v845_v51, %v844_v36 }
 0x37e   :  { %3513 = vtanh.f32 %v1019_v49  ;;  %v833_v24 = vrot.slane %v832_v10, 2  ;;  %v852_v58 = vrot.slane %v851_v55, 4  ;;  %v859_v22 = vrot.slane %v858_v3, 4 }
 0x37f   :  { %3515 = vtanh.f32 %v1020_v9  ;;  %v827_v40 = vadd.f32 %v826_v56, %v825_v33  ;;  %v840_v59 = vrot.slane %v839_v6, 2  ;;  %v847_v0 = vrot.slane %v846_v11, 2 }
 0x380   :  { %v834_v17 = vadd.f32 %v833_v24, %v832_v10  ;;  %v853_v5 = vadd.f32 %v852_v58, %v851_v55  ;;  %v860_v54 = vadd.f32 %v859_v22, %v858_v3  ;;  %v865_v25 = vsel %vm155_vm2, %v4065_v52, 0.0 }
 0x381   :  { %v828_v46 = vrot.slane %v827_v40, 1  ;;  %v841_v26 = vadd.f32 %v840_v59, %v839_v6  ;;  %v848_v57 = vadd.f32 %v847_v0, %v846_v11  ;;  %v866_v23 = vrot.slane %v865_v25, 4 }
 0x382   :  { %v835_v27 = vrot.slane %v834_v17, 1  ;;  %v854_v60 = vrot.slane %v853_v5, 2  ;;  %v861_v12 = vrot.slane %v860_v54, 2  ;;  %v872_v53 = vsel %vm155_vm2, %v4089_v44, 0.0 }
 0x383   :  { %v842_v15 = vrot.slane %v841_v26, 1  ;;  %v849_v39 = vrot.slane %v848_v57, 1  ;;  %v867_v31 = vadd.f32 %v866_v23, %v865_v25  ;;  %v4111_v18 = vmul.f32 %v4040_v19, %v4031_v34 }
 0x384   :  { %v940_v28 = vmul.f32 0.5, %v4069_v1  ;;  %v855_v52 = vadd.f32 %v854_v60, %v853_v5  ;;  %v862_v21 = vadd.f32 %v861_v12, %v860_v54  ;;  %v873_v20 = vrot.slane %v872_v53, 4 }
 0x385   :  { %v3502_v61 = vpop.eup %3501  ;;  %v829_v29 = vadd.f32 %v828_v46, %v827_v40  ;;  %v836_v45 = vadd.f32 %v835_v27, %v834_v17  ;;  %v843_v62 = vadd.f32 %v842_v15, %v841_v26  ;;  %v868_v47 = vrot.slane %v867_v31, 2 }
 0x386   :  { %v3504_v48 = vpop.eup %3503  ;;  %v1045_v49 = vadd.f32 1.0, %v3502_v61  ;;  %v856_v44 = vrot.slane %v855_v52, 1  ;;  %v863_v9 = vrot.slane %v862_v21, 1  ;;  %v874_v35 = vadd.f32 %v873_v20, %v872_v53 }
 0x387   :  { %v3506_v8 = vpop.eup %3505  ;;  %v1046_v32 = vadd.f32 1.0, %v3504_v48  ;;  %v850_v63 = vadd.f32 %v849_v39, %v848_v57  ;;  %v869_v19 = vadd.f32 %v868_v47, %v867_v31  ;;  %v894_v36 = vrot.slane %v4111_v18, 1 }
 0x388   :  { %v3508_v1 = vpop.eup %3507  ;;  %v1047_v33 = vadd.f32 1.0, %v3506_v8  ;;  %v1061_v37 = vmul.f32 %v1045_v49, %v4073_v2  ;;  %v895_v51 = vrot.slane %v4111_v18, 2  ;;  %v896_v10 = vrot.slane %v4111_v18, 3 }
 0x389   :  { %v3510_v55 = vpop.eup %3509  ;;  %v1048_v3 = vadd.f32 1.0, %v3508_v1  ;;  %v1062_v56 = vmul.f32 %v1046_v32, %v4075_v41  ;;  %v857_v6 = vadd.f32 %v856_v44, %v855_v52  ;;  %v875_v11 = vrot.slane %v874_v35, 2 }
 0x38a   :  { %v3512_v24 = vpop.eup %3511  ;;  %v1049_v58 = vadd.f32 1.0, %v3510_v55  ;;  %v1063_v22 = vmul.f32 %v1047_v33, %v4077_v30  ;;  %v864_v40 = vadd.f32 %v863_v9, %v862_v21  ;;  %v870_v59 = vrot.slane %v869_v19, 1 }
 0x38b   :  { %v3514_v0 = vpop.eup %3513  ;;  %v1050_v17 = vadd.f32 1.0, %v3512_v24  ;;  %v1064_v2 = vmul.f32 %v1048_v3, %v4079_v42  ;;  %v1101_v5 = vrot.slane %v1062_v56, 7  ;;  %v897_v54 = vrot.slane %v4111_v18, 4 }
 0x38c   :  { %v3516_v25 = vpop.eup %3515  ;;  %v1051_v46 = vadd.f32 1.0, %v3514_v0  ;;  %v1065_v26 = vmul.f32 %v1049_v58, %v4081_v43  ;;  %v1103_v41 = vrot.slane %v1063_v22, 6  ;;  %v876_v57 = vadd.f32 %v875_v11, %v874_v35 }
 0x38d   :  { %v1052_v23 = vadd.f32 1.0, %v3516_v25  ;;  %v1066_v27 = vmul.f32 %v1050_v17, %v4083_v38  ;;  %v1102_v30 = vsel %vm491_vm3, %v1101_v5, %v1061_v37  ;;  %v1105_v60 = vrot.slane %v1064_v2, 5 }
 0x38e   :  { %v1067_v12 = vmul.f32 %v1051_v46, %v4085_v4  ;;  %v1104_v53 = vsel %vm494_vm4, %v1103_v41, %v1102_v30  ;;  %v1107_v42 = vrot.slane %v1065_v26, 4  ;;  %v877_v15 = vrot.slane %v876_v57, 1 }
 0x38f   :  { %v1068_v39 = vmul.f32 %v1052_v23, %v940_v28  ;;  %v1106_v31 = vsel %vm497_vm5, %v1105_v60, %v1104_v53  ;;  %v1109_v52 = vrot.slane %v1066_v27, 3  ;;  %v898_v43 = vrot.slane %v4111_v18, 5 }
 0x390   :  { %v1108_v21 = vsel %vm500_vm6, %v1107_v42, %v1106_v31  ;;  %v1111_v20 = vrot.slane %v1067_v12, 2  ;;  %v871_v61 = vadd.f32 %v870_v59, %v869_v19  ;;  %v878_v38 = vadd.f32 %v877_v15, %v876_v57 }
 0x391   :  { %v1110_v47 = vsel %vm503_vm7, %v1109_v52, %v1108_v21  ;;  %v1113_v48 = vrot.slane %v1068_v39, 1  ;;  %v899_v4 = vrot.slane %v4111_v18, 6  ;;  %v900_v49 = vrot.slane %v4111_v18, 7 }
 0x392   :  { %v1112_v44 = vsel %vm506_vm8, %v1111_v20, %v1110_v47  ;;  %v4135_v28 = vadd.f32 %v4111_v18, %v829_v29  ;;  %v926_v9 = vadd.f32 %v894_v36, %v836_v45  ;;  %v4137_v35 = vadd.f32 %v895_v51, %v843_v62 }
 0x393   :  { %v1114_v8 = vsel %vm509_vm9, %v1113_v48, %v1112_v44  ;;  %v4140_v32 = vadd.f32 %v896_v10, %v850_v63  ;;  %v4142_v19 = vadd.f32 %v897_v54, %v857_v6  ;;  %v4144_v1 = vadd.f32 %v898_v43, %v864_v40 }
 0x394   :  { %3368 = vmatprep.mubr.msk.f32.mxu1 %vm155_vm2, %v1114_v8  ;;  %3379 = vmatprep.mubr.msk.f32.mxu0 %vm155_vm2, %v1114_v8  ;;  %v4148_v33 = vadd.f32 %v899_v4, %v871_v61  ;;  %v4150_v37 = vadd.f32 %v900_v49, %v878_v38  ;;  %v957_v18 = vmul.f32 0.044715, %v4135_v28  ;;  %v958_v29 = vmul.f32 0.044715, %v926_v9 }
 0x395   :  { %v959_v45 = vmul.f32 0.044715, %v4137_v35  ;;  %v960_v62 = vmul.f32 0.044715, %v4140_v32  ;;  %v961_v63 = vmul.f32 0.044715, %v4142_v19 }
 0x396   :  { %v962_v36 = vmul.f32 0.044715, %v4144_v1  ;;  %v963_v51 = vmul.f32 0.044715, %v4148_v33  ;;  %v964_v10 = vmul.f32 0.044715, %v4150_v37  ;;  %v973_v55 = vmul.f32 %v957_v18, %v4135_v28 }
 0x397   :  { %v974_v3 = vmul.f32 %v958_v29, %v926_v9  ;;  %v975_v56 = vmul.f32 %v959_v45, %v4137_v35  ;;  %v976_v6 = vmul.f32 %v960_v62, %v4140_v32  ;;  %v977_v11 = vmul.f32 %v961_v63, %v4142_v19 }
 0x398   :  { %v978_v24 = vmul.f32 %v962_v36, %v4144_v1  ;;  %v979_v58 = vmul.f32 %v963_v51, %v4148_v33  ;;  %v980_v22 = vmul.f32 %v964_v10, %v4150_v37  ;;  %v989_v40 = vmul.f32 %v973_v55, %v4135_v28 }
 0x399   :  { %v990_v59 = vmul.f32 %v974_v3, %v926_v9  ;;  %v991_v0 = vmul.f32 %v975_v56, %v4137_v35  ;;  %v992_v17 = vmul.f32 %v976_v6, %v4140_v32  ;;  %v993_v2 = vmul.f32 %v977_v11, %v4142_v19 }
 0x39a   :  { %v994_v5 = vmul.f32 %v978_v24, %v4144_v1  ;;  %v995_v54 = vmul.f32 %v979_v58, %v4148_v33  ;;  %v996_v25 = vmul.f32 %v980_v22, %v4150_v37  ;;  %v1005_v46 = vadd.f32 %v989_v40, %v4135_v28 }
 0x39b   :  { %v1006_v26 = vadd.f32 %v990_v59, %v926_v9  ;;  %v1007_v41 = vadd.f32 %v991_v0, %v4137_v35  ;;  %v1008_v57 = vadd.f32 %v992_v17, %v4140_v32  ;;  %v1009_v23 = vadd.f32 %v993_v2, %v4142_v19 }
 0x39c   :  { %v1010_v27 = vadd.f32 %v994_v5, %v4144_v1  ;;  %v1011_v30 = vadd.f32 %v995_v54, %v4148_v33  ;;  %v1021_v60 = vmul.f32 0.7978846, %v1005_v46  ;;  %v1012_v53 = vadd.f32 %v996_v25, %v4150_v37 }
 0x39d   :  { %v1022_v12 = vmul.f32 0.7978846, %v1006_v26  ;;  %v1023_v42 = vmul.f32 0.7978846, %v1007_v41  ;;  %v1024_v15 = vmul.f32 0.7978846, %v1008_v57 }
 0x39e   :  { %v1025_v39 = vmul.f32 0.7978846, %v1009_v23  ;;  %3517 = vtanh.f32 %v1021_v60  ;;  %v1026_v31 = vmul.f32 0.7978846, %v1010_v27  ;;  %v1027_v52 = vmul.f32 0.7978846, %v1011_v30 }
 0x39f   :  { %3519 = vtanh.f32 %v1022_v12  ;;  %v1028_v43 = vmul.f32 0.7978846, %v1012_v53  ;;  %v942_v38 = vmul.f32 0.5, %v926_v9  ;;  %v941_v49 = vmul.f32 0.5, %v4135_v28  ;;  %v4199_v23 = vld [vmem:[%s4468_s3 + $0x8] sm:$0x7] }
 0x3a0   :  { %3521 = vtanh.f32 %v1023_v42  ;;  %v943_v44 = vmul.f32 0.5, %v4137_v35  ;;  %v944_v29 = vmul.f32 0.5, %v4140_v32  ;;  %v945_v45 = vmul.f32 0.5, %v4142_v19 }
 0x3a1   :  { %3523 = vtanh.f32 %v1024_v15  ;;  %v946_v51 = vmul.f32 0.5, %v4144_v1  ;;  %v947_v9 = vmul.f32 0.5, %v4148_v33  ;;  %v948_v24 = vmul.f32 0.5, %v4150_v37 }
 0x3a2   :  { %3525 = vtanh.f32 %v1025_v39  ;;  %v1215_v27 = vrot.slane %v4199_v23, %v3989_v7 }
 0x3a3   :  { %3527 = vtanh.f32 %v1026_v31 }
 0x3a4   :  { %3529 = vtanh.f32 %v1027_v52 }
 0x3a5   :  { %3531 = vtanh.f32 %v1028_v43 }
 0x3ab   :  { %v3518_v21 = vpop.eup %3517 }
 0x3ac   :  { %v3520_v20 = vpop.eup %3519  ;;  %v1053_v47 = vadd.f32 1.0, %v3518_v21 }
 0x3ad   :  { %v3522_v61 = vpop.eup %3521  ;;  %v1054_v48 = vadd.f32 1.0, %v3520_v20  ;;  %v1084_v20 = vrot.slane %v4199_v23, %v3724_v16 }
 0x3ae   :  { %v3524_v4 = vpop.eup %3523  ;;  %v1055_v8 = vadd.f32 1.0, %v3522_v61  ;;  %v1069_v28 = vmul.f32 %v1053_v47, %v941_v49 }
 0x3af   :  { %v3526_v18 = vpop.eup %3525  ;;  %v1056_v62 = vadd.f32 1.0, %v3524_v4  ;;  %v1070_v63 = vmul.f32 %v1054_v48, %v942_v38 }
 0x3b0   :  { %v3528_v36 = vpop.eup %3527  ;;  %v1057_v10 = vadd.f32 1.0, %v3526_v18  ;;  %v1071_v55 = vmul.f32 %v1055_v8, %v943_v44 }
 0x3b1   :  { %v3530_v3 = vpop.eup %3529  ;;  %v1058_v56 = vadd.f32 1.0, %v3528_v36  ;;  %v1072_v6 = vmul.f32 %v1056_v62, %v944_v29  ;;  %v1115_v35 = vrot.slane %v1070_v63, 7 }
 0x3b2   :  { %v3532_v11 = vpop.eup %3531  ;;  %v1059_v32 = vadd.f32 1.0, %v3530_v3  ;;  %v1073_v58 = vmul.f32 %v1057_v10, %v945_v45  ;;  %v1117_v19 = vrot.slane %v1071_v55, 6 }
 0x3b3   :  { %v1060_v22 = vadd.f32 1.0, %v3532_v11  ;;  %v1074_v40 = vmul.f32 %v1058_v56, %v946_v51  ;;  %v1116_v59 = vsel %vm491_vm3, %v1115_v35, %v1069_v28  ;;  %v1119_v1 = vrot.slane %v1072_v6, 5  ;;  %v1372_v28 = vld [vmem:[#allocation2 + $0x50] sm:$0xff]  ;;  %v1371_v6 = vld [vmem:[#allocation2 + $0x48] sm:$0xff]  ;;  %v1369_v11 = vld [vmem:[#allocation2 + $0x38] sm:$0xff] }
 0x3b4   :  { %v1075_v0 = vmul.f32 %v1059_v32, %v947_v9  ;;  %v1118_v33 = vsel %vm494_vm4, %v1117_v19, %v1116_v59  ;;  %v1121_v17 = vrot.slane %v1073_v58, 4  ;;  %v3641_v35 = vmov 0.0   ;;  %1446 = vmatprep.subr.mxu1 %v1372_v28  ;;  %v1368_v32 = vld [vmem:[#allocation2 + $0x30] sm:$0xff]  ;;  %v1366_v58 = vld [vmem:[#allocation2 + $0x20] sm:$0xff]  ;;  %v1367_v19 = vld [vmem:[#allocation2 + $0x28] sm:$0xff] }
 0x3b5   :  { %v1076_v2 = vmul.f32 %v1060_v22, %v948_v24  ;;  %v1120_v5 = vsel %vm497_vm5, %v1119_v1, %v1118_v33  ;;  %v1123_v54 = vrot.slane %v1074_v40, 3  ;;  %3382 = vmatprep.subr.mxu0 %v3641_v35  ;;  %v1370_v24 = vld [vmem:[#allocation2 + $0x40] sm:$0xff]  ;;  %v1365_v22 = vld [vmem:[#allocation2 + $0x18] sm:$0xff]  ;;  %v1363_v40 = vld [vmem:[#allocation2 + $0x8] sm:$0xff] }
 0x3b6   :  { %v1122_v25 = vsel %vm500_vm6, %v1121_v17, %v1120_v5  ;;  %v1125_v46 = vrot.slane %v1075_v0, 2  ;;  %v1364_v59 = vld [vmem:[#allocation2 + $0x10] sm:$0xff]  ;;  %v1362_v1 = vld [vmem:[#allocation2] sm:$0xff]  ;;  %v4284_v28 = vld [vmem:[#allocation2 + $0xb8] sm:$0xff] }
 0x3b7   :  { %v1124_v37 = vsel %vm503_vm7, %v1123_v54, %v1122_v25  ;;  %v1127_v26 = vrot.slane %v1076_v2, 1  ;;  %v4219_v0 = vld [vmem:[#allocation2 + $0x80] sm:$0x1] }
 0x3b8   :  { %v1126_v41 = vsel %vm506_vm8, %v1125_v46, %v1124_v37  ;;  %v1335_v46 = vsub.s32 7, %v3713_v13  ;;  %v3593_v37 = vld [vmem:[%s4468_s3] sm:$0xff]  ;;  %s3643_s3 = smov [#allocation5]  }
 0x3b9   :  { %v1128_v57 = vsel %vm509_vm9, %v1127_v26, %v1126_v41  ;;  %s3190_s20 = sshll.u32 %s3643_s3, 4  ;;  %s3191_s20 = int_to_ptr.vmem [resolvable:$true] %s3190_s20 }
 0x3ba   :  { %3369 = vmatmul.mubr.msk.f32.vlgmr.msra.gmra.mxu1 %vm155_vm2, %v1128_v57  ;;  %3380 = vmatmul.mubr.msk.f32.vlgmr.msra.gmra.mxu0 %vm155_vm2, %v1128_v57  ;;  %v1336_v26 = vrot.slane %v3593_v37, %v1335_v46  ;;  %v1342_v57 = vrot.slane %v4199_v23, %v3716_v14  ;;  %s3614_s21 = scalar_lea.vmem %s3191_s20, 32  ;;  %p3619_p6 = scmp.lt.s32.totalorder %s3191_s20, %s3191_s20 }
 0x3bb   :  { %1447 = vmatpush1.msra.mxu1 %v1371_v6  ;;  %1486 = vmatprep.mubr.f32.mxu1 %v3641_v35  ;;  %v1381_v6 = vld [vmem:[#allocation2 + $0x90] ss:$8 sm:$0x7]  ;;  %p3615_p5 = scmp.ne.s32.totalorder %s3191_s20, %s3614_s21  ;;  %p3620_p7 = scmp.lt.s32.totalorder %s3614_s21, %s3614_s21 }
 0x3bc   :  { %1448 = vmatprep.subr.mxu1 %v1369_v11  ;;  %3390 = vmatprep.mubr.msk.f32.mxu0 %vm3642_vm10, %v3641_v35  ;;  %v1413_v11 = vrot.slane %v1381_v6, %v3989_v7 }
 0x3bd   :  { %1449 = vmatpush1.msra.mxu1 %v1368_v32  ;;  %p3621_p8 = por %p3620_p7, %p3619_p6 }
 0x3be   :  { %1450 = vmatprep.subr.mxu1 %v1366_v58 }
 0x3bf   :  { %1451 = vmatpush1.msra.mxu1 %v1365_v22  ;;  %p3622_p9 = pnand %p3621_p8, %p3615_p5 }
 0x3c0   :  { %1452 = vmatprep.subr.mxu1 %v1363_v40 }
 0x3c1   :  { %1453 = vmatpush1.msra.mxu1 %v1362_v1 }
 0x3c2   :  { %3224 = vmatprep.subr.msk.mxu1 %vm1567_vm11, %v4219_v0 }
 0x47a   :  { %v3381_v30 = vpop.f32.mrf.mxu0  ;;  %v3370_v21 = vpop.f32.mrf.mxu1 }
 0x47b   :  { %v1288_v60 = vadd.f32 %v3381_v30, %v1215_v27  ;;  %v1205_v38 = vadd.f32 %v3370_v21, %v1084_v20 }
 0x47c   :  { %v1282_v12 = vpop.f32.mrf.mxu0  ;;  %v1199_v61 = vpop.f32.mrf.mxu1 }
 0x47d   :  { %v3221_v53 = vmul.f32 -1.442695, %v1288_v60  ;;  %v1283_v42 = vadd.f32 %v1282_v12, %v1215_v27  ;;  %v1200_v48 = vadd.f32 %v1199_v61, %v1084_v20 }
 0x47f   :  { %3533 = vpow2.f32 %v3221_v53  ;;  %v3220_v15 = vmul.f32 -1.442695, %v1283_v42 }
 0x481   :  { %3535 = vpow2.f32 %v3220_v15 }
 0x48c   :  { %v3534_v39 = vpop.eup %3533 }
 0x48d   :  { %v1298_v31 = vadd.f32 1.0, %v3534_v39 }
 0x48e   :  { %v3536_v52 = vpop.eup %3535 }
 0x48f   :  { %3537 = vrcp.f32 %v1298_v31  ;;  %v1297_v43 = vadd.f32 1.0, %v3536_v52 }
 0x491   :  { %3539 = vrcp.f32 %v1297_v43 }
 0x49c   :  { %v3538_v47 = vpop.eup %3537 }
 0x49d   :  { %v1304_v4 = vmul.f32 %v3538_v47, %v1205_v38 }
 0x49e   :  { %v3540_v49 = vpop.eup %3539 }
 0x49f   :  { %v1306_v44 = vadd.f32 %v1304_v4, %v4031_v34  ;;  %v1303_v8 = vmul.f32 %v3540_v49, %v1200_v48 }
 0x4a1   :  { %v1310_v18 = vsel %vm155_vm2, %v1306_v44, 0.0  ;;  %v1305_v29 = vadd.f32 %v1303_v8, %v4007_v50  ;;  %v1373_v50 = vld [vmem:[#allocation2 + $0x58] sm:$0xff] }
 0x4a2   :  { %1311 = vadd.xlane.f32.xlu1 %v1310_v18  ;;  %3383 = vmatpush3.msra.mxu0 %v1373_v50  ;;  %v4231_v18 = vld [vmem:[#allocation2 + $0x88] sm:$0x1] }
 0x4a3   :  { %v1307_v45 = vsel %vm155_vm2, %v1305_v29, 0.0  ;;  %3384 = vmatprep.subr.mxu0 %v3641_v35  ;;  %v4290_v50 = vld [vmem:[#allocation2 + $0xa8] sm:$0xff] }
 0x4a4   :  { %1308 = vadd.xlane.f32.xlu0 %v1307_v45  ;;  %3385 = vmatpush3.msra.mxu0 %v1370_v24 }
 0x4a5   :  { %3386 = vmatprep.subr.mxu0 %v3641_v35 }
 0x4a6   :  { %3387 = vmatpush3.msra.mxu0 %v1367_v19 }
 0x4a7   :  { %3388 = vmatprep.subr.mxu0 %v3641_v35 }
 0x4a8   :  { %3389 = vmatpush3.msra.mxu0 %v1364_v59 }
 0x4a9   :  { %3393 = vmatprep.subr.mxu0 %v3641_v35 }
 0x52b   :  { %v1312_v62 = vpop.xlane.xlu1 %1311 }
 0x52c   :  { %v1314_v63 = vmul.f32 0.03125, %v1312_v62  ;;  %v4236_v62 = vld [vmem:[#allocation2 + $0x68] sm:$0xff] }
 0x52d   :  { %v1309_v36 = vpop.xlane.xlu0 %1308 }
 0x52e   :  { %v1316_v51 = vsub.f32 %v1306_v44, %v1314_v63  ;;  %v1313_v9 = vmul.f32 0.03125, %v1309_v36  ;;  %v4240_v63 = vld [vmem:[#allocation2 + $0x70] sm:$0xff]  ;;  %v4242_v36 = vld [vmem:[#allocation2 + $0x60] sm:$0xff] }
 0x530   :  { %v1315_v10 = vsub.f32 %v1305_v29, %v1313_v9  ;;  %v1318_v55 = vmul.f32 %v1316_v51, %v1316_v51  ;;  %v4233_v29 = vld [vmem:[#allocation2 + $0x78] sm:$0x1]  ;;  %v4263_v9 = vld [vmem:[#allocation2 + $0xe0] sm:$0x1f] }
 0x532   :  { %v1322_v3 = vsel %vm155_vm2, %v1318_v55, 0.0  ;;  %v1317_v56 = vmul.f32 %v1315_v10, %v1315_v10  ;;  %v4271_v55 = vld [vmem:[#allocation2 + $0xc8] sm:$0x1] }
 0x533   :  { %1323 = vadd.xlane.f32.xlu1 %v1322_v3  ;;  %v4273_v3 = vld [vmem:[#allocation2 + $0xd0] sm:$0x1] }
 0x534   :  { %v1319_v34 = vsel %vm155_vm2, %v1317_v56, 0.0  ;;  %v4278_v56 = vld [vmem:[#allocation2 + $0xc0] sm:$0x1] }
 0x535   :  { %1320 = vadd.xlane.f32.xlu0 %v1319_v34  ;;  %v4282_v34 = vld [vmem:[#allocation2 + $0xb0] sm:$0xff] }
 0x5bc   :  { %v1324_v33 = vpop.xlane.xlu1 %1323 }
 0x5bd   :  { %v1326_v17 = vmul.f32 0.03125, %v1324_v33 }
 0x5be   :  { %v1321_v2 = vpop.xlane.xlu0 %1320 }
 0x5bf   :  { %v1328_v5 = vadd.f32 1e-05, %v1326_v17  ;;  %v1325_v54 = vmul.f32 0.03125, %v1321_v2  ;;  %v1405_v17 = vrot.slane %v1381_v6, %v3716_v14 }
 0x5c1   :  { %3541 = vrsqrt.f32 %v1328_v5  ;;  %v1327_v25 = vadd.f32 1e-05, %v1325_v54  ;;  %v1409_v5 = vrot.slane %v1381_v6, %v3724_v16 }
 0x5c3   :  { %3543 = vrsqrt.f32 %v1327_v25 }
 0x5ce   :  { %v3542_v41 = vpop.eup %3541 }
 0x5cf   :  { %v1332_v27 = vmul.f32 %v3542_v41, %v1316_v51  ;;  %v4261_v51 = vld [vmem:[#allocation2 + $0xe8] sm:$0x1f] }
 0x5d0   :  { %v3544_v30 = vpop.eup %3543 }
 0x5d1   :  { %v1338_v60 = vmul.f32 %v1336_v26, %v1332_v27  ;;  %v1331_v12 = vmul.f32 %v3544_v30, %v1315_v10  ;;  %v4269_v10 = vld [vmem:[#allocation2 + $0xd8] sm:$0x1f] }
 0x5d3   :  { %v1337_v53 = vmul.f32 %v1336_v26, %v1331_v12  ;;  %v1344_v42 = vadd.f32 %v1342_v57, %v1338_v60 }
 0x5d5   :  { %v1343_v15 = vadd.f32 %v1342_v57, %v1337_v53  ;;  %v1352_v39 = vsel %vm155_vm2, %v1344_v42, 0.0 }
 0x5d6   :  { %v1353_v31 = vrot.slane %v1352_v39, 4 }
 0x5d7   :  { %v1345_v13 = vsel %vm155_vm2, %v1343_v15, 0.0 }
 0x5d8   :  { %v1346_v52 = vrot.slane %v1345_v13, 4  ;;  %v1354_v43 = vadd.f32 %v1353_v31, %v1352_v39 }
 0x5da   :  { %v1347_v21 = vadd.f32 %v1346_v52, %v1345_v13  ;;  %v1355_v20 = vrot.slane %v1354_v43, 2  ;;  %v4323_v13 = vld [vmem:[#allocation2 + $0x130] sm:$0x3f]  ;;  %v4325_v52 = vld [vmem:[#allocation2 + $0x128] sm:$0x3f] }
 0x5dc   :  { %v1348_v61 = vrot.slane %v1347_v21, 2  ;;  %v1356_v38 = vadd.f32 %v1355_v20, %v1354_v43  ;;  %v4331_v43 = vld [vmem:[#allocation2 + $0x120] sm:$0x3f]  ;;  %v4335_v20 = vld [vmem:[#allocation2 + $0x110] sm:$0x1f] }
 0x5de   :  { %v1349_v47 = vadd.f32 %v1348_v61, %v1347_v21  ;;  %v1357_v23 = vrot.slane %v1356_v38, 1  ;;  %v4333_v21 = vld [vmem:[#allocation2 + $0x118] sm:$0x1f]  ;;  %v4340_v61 = vld [vmem:[#allocation2 + $0x108] sm:$0x1f] }
 0x5e0   :  { %v1350_v48 = vrot.slane %v1349_v47, 1  ;;  %v1358_v4 = vadd.f32 %v1357_v23, %v1356_v38  ;;  %v1392_v38 = vld [vmem:[#allocation2 + $0xf0] ss:$8 sm:$0x7] }
 0x5e2   :  { %v1351_v49 = vadd.f32 %v1350_v48, %v1349_v47  ;;  %v1361_v8 = vmul.f32 0.125, %v1358_v4  ;;  %v4357_v47 = vrot.slane %v1392_v38, %v3989_v7 }
 0x5e4   :  { %v1360_v44 = vmul.f32 0.125, %v1351_v49 }
 0x5e6   :  { %v1419_v45 = vsel %vm491_vm3, %v1361_v8, %v1360_v44 }
 0x5e7   :  { %3222 = vmatmul.mubr.msk.f32.vlgmr.msra.gmra.mxu1 %vm155_vm2, %v1419_v45  ;;  %3391 = vmatmul.mubr.msk.f32.vlgmr.msra.gmra.mxu0 %vm155_vm2, %v1419_v45 }
 0x5e8   :  { %3394 = vmatpush3.msk.msra.mxu0 %vm1567_vm11, %v4231_v18  ;;  %3225 = vmatpush1.msk.msra.mxu1 %vm1567_vm11, %v4233_v29 }
 0x5e9   :  { %3395 = vmatprep.subr.mxu0 %v3641_v35  ;;  %1607 = vmatprep.subr.mxu1 %v4236_v62 }
 0x5ea   :  { %3396 = vmatpush3.msra.mxu0 %v4240_v63  ;;  %1608 = vmatpush1.msra.mxu1 %v4242_v36 }
 0x5eb   :  { %1641 = vmatprep.mubr.f32.mxu1 %v3641_v35  ;;  %3397 = vmatprep.mubr.msk.f32.mxu0 %vm3642_vm10, %v3641_v35 }
 0x5ec   :  { %1642 = vmatmul.mubr.f32.vlgmr.msra.gmra.mxu1 %v3641_v35  ;;  %3398 = vmatmul.mubr.f32.vlgmr.msra.gmra.mxu0 %v3641_v35 }
 0x5ed   :  { %3400 = vmatprep.subr.mxu0 %v3641_v35  ;;  %3402 = vmatprep.mubr.msk.f32.mxu0 %vm3642_vm10, %v3641_v35 }
 0x5ee   :  { %1810 = vmatprep.mubr.f32.mxu1 %v3641_v35  ;;  %3401 = vmatpush3.msk.msra.mxu0 %vm1736_vm12, %v4261_v51 }
 0x5ef   :  { %3228 = vmatprep.subr.msk.mxu1 %vm1736_vm12, %v4263_v9  ;;  %3405 = vmatprep.subr.mxu0 %v3641_v35 }
 0x5f0   :  { %3403 = vmatmul.mubr.f32.vlgmr.msra.gmra.mxu0 %v3641_v35  ;;  %3229 = vmatpush1.msk.msra.mxu1 %vm1736_vm12, %v4269_v10 }
 0x5f1   :  { %1811 = vmatmul.mubr.f32.vlgmr.msra.gmra.mxu1 %v3641_v35  ;;  %3231 = vmatprep.subr.msk.mxu1 %vm1567_vm11, %v4271_v55 }
 0x5f2   :  { %3406 = vmatpush3.msk.msra.mxu0 %vm1567_vm11, %v4273_v3  ;;  %3232 = vmatpush1.msk.msra.mxu1 %vm1567_vm11, %v4278_v56 }
 0x5f3   :  { %3407 = vmatprep.subr.mxu0 %v3641_v35  ;;  %1929 = vmatprep.subr.mxu1 %v4282_v34 }
 0x5f4   :  { %3408 = vmatpush3.msra.mxu0 %v4284_v28  ;;  %1930 = vmatpush1.msra.mxu1 %v4290_v50 }
 0x5f5   :  { %1963 = vmatprep.mubr.f32.mxu1 %v3641_v35  ;;  %3409 = vmatprep.mubr.msk.f32.mxu0 %vm3642_vm10, %v3641_v35 }
 0x5f6   :  { %3412 = vmatprep.subr.mxu0 %v3641_v35  ;;  %3237 = vmatprep.subr.msk.mxu1 %vm2074_vm14, %v4325_v52 }
 0x6a7   :  { %v1559_v24 = vpop.f32.mrf.mxu0  ;;  %v1488_v1 = vpop.f32.mrf.mxu1 }
 0x6a8   :  { %v4303_v58 = vadd.f32 %v1559_v24, %v1413_v11  ;;  %v4308_v54 = vadd.f32 %v1488_v1, %v1405_v17 }
 0x6a9   :  { %v3392_v32 = vpop.f32.mrf.mxu0  ;;  %v1490_v33 = vpop.f32.mrf.mxu1 }
 0x6aa   :  { %v4310_v46 = vadd.f32 %v1490_v33, %v1409_v5  ;;  %v4361_v32 = vrot.slane %v1392_v38, %v3716_v14 }
 0x6ac   :  { %v1714_v19 = vpop.f32.mrf.mxu0  ;;  %v1643_v2 = vpop.f32.mrf.mxu1 }
 0x6ad   :  { %v1720_v22 = vadd.f32 %v1714_v19, %v4303_v58  ;;  %v1718_v26 = vadd.f32 %v1643_v2, %v4308_v54  ;;  %v4364_v19 = vrot.slane %v1392_v38, %v3724_v16 }
 0x6ae   :  { %v3399_v40 = vpop.f32.mrf.mxu0  ;;  %v1645_v25 = vpop.f32.mrf.mxu1 }
 0x6af   :  { %v3227_v59 = vmul.f32 -1.442695, %v1720_v22  ;;  %v1719_v57 = vadd.f32 %v1645_v25, %v4310_v46 }
 0x6b0   :  { %v1883_v39 = vpop.f32.mrf.mxu0 }
 0x6b1   :  { %3545 = vpow2.f32 %v3227_v59  ;;  %v1812_v4 = vpop.f32.mrf.mxu1 }
 0x6b2   :  { %v3404_v31 = vpop.f32.mrf.mxu0 }
 0x6b3   :  { %v1814_v45 = vpop.f32.mrf.mxu1 }
 0x6be   :  { %v3546_v37 = vpop.eup %3545 }
 0x6bf   :  { %v1726_v41 = vadd.f32 1.0, %v3546_v37 }
 0x6c1   :  { %3547 = vrcp.f32 %v1726_v41 }
 0x6c2   :  { %3549 = vtanh.f32 %v1718_v26 }
 0x6c3   :  { %3551 = vtanh.f32 %v1719_v57 }
 0x6ce   :  { %v3548_v27 = vpop.eup %3547 }
 0x6cf   :  { %v3550_v30 = vpop.eup %3549  ;;  %v1729_v60 = vsub.f32 1.0, %v3548_v27 }
 0x6d0   :  { %v3552_v12 = vpop.eup %3551 }
 0x6d1   :  { %v1730_v53 = vmul.f32 %v3550_v30, %v1729_v60  ;;  %v1731_v42 = vmul.f32 %v3552_v12, %v3548_v27 }
 0x6d3   :  { %v4314_v15 = vadd.f32 %v1731_v42, %v1730_v53 }
 0x6d5   :  { %3233 = vmatmul.mubr.msk.f32.vlgmr.msra.gmra.mxu1 %vm1563_vm13, %v4314_v15  ;;  %3410 = vmatmul.mubr.msk.f32.vlgmr.msra.gmra.mxu0 %vm1563_vm13, %v4314_v15 }
 0x6d6   :  { %3414 = vmatprep.mubr.msk.f32.mxu0 %vm3642_vm10, %v3641_v35  ;;  %2148 = vmatprep.mubr.f32.mxu1 %v3641_v35 }
 0x6d7   :  { %3413 = vmatpush3.msk.msra.mxu0 %vm2074_vm14, %v4323_v13  ;;  %3238 = vmatpush1.msk.msra.mxu1 %vm2074_vm14, %v4331_v43 }
 0x6d8   :  { %3417 = vmatprep.subr.mxu0 %v3641_v35  ;;  %3240 = vmatprep.subr.msk.mxu1 %vm1736_vm12, %v4335_v20 }
 0x6d9   :  { %3415 = vmatmul.mubr.f32.vlgmr.msra.gmra.mxu0 %v3641_v35  ;;  %2149 = vmatmul.mubr.f32.vlgmr.msra.gmra.mxu1 %v3641_v35 }
 0x6da   :  { %3418 = vmatpush3.msk.msra.mxu0 %vm1736_vm12, %v4333_v21  ;;  %3241 = vmatpush1.msk.msra.mxu1 %vm1736_vm12, %v4340_v61 }
 0x6db   :  { %2301 = vmatprep.mubr.f32.mxu1 %v3641_v35  ;;  %3419 = vmatprep.mubr.msk.f32.mxu0 %vm3642_vm10, %v3641_v35 }
 0x6dc   :  { %3422 = vmatprep.subr.mxu0 %v3641_v35  ;;  %3246 = vmatprep.subr.msk.mxu1 %vm1567_vm11, %v4219_v0 }
 0x795   :  { %v2036_v23 = vpop.f32.mrf.mxu0  ;;  %v1965_v6 = vpop.f32.mrf.mxu1 }
 0x796   :  { %v2037_v48 = vadd.f32 %v2036_v23, %v1883_v39  ;;  %v1966_v24 = vadd.f32 %v1965_v6, %v1812_v4 }
 0x797   :  { %v3411_v49 = vpop.f32.mrf.mxu0  ;;  %v1967_v11 = vpop.f32.mrf.mxu1 }
 0x798   :  { %v2058_v44 = vadd.f32 %v4357_v47, %v2037_v48  ;;  %v1968_v0 = vadd.f32 %v1967_v11, %v1814_v45  ;;  %v2056_v40 = vadd.f32 %v4361_v32, %v1966_v24 }
 0x79a   :  { %v3236_v8 = vmul.f32 -1.442695, %v2058_v44  ;;  %v2057_v1 = vadd.f32 %v4364_v19, %v1968_v0 }
 0x79c   :  { %3553 = vpow2.f32 %v3236_v8 }
 0x7a9   :  { %v3554_v22 = vpop.eup %3553 }
 0x7aa   :  { %v2064_v59 = vadd.f32 1.0, %v3554_v22 }
 0x7ac   :  { %3555 = vrcp.f32 %v2064_v59 }
 0x7ad   :  { %3557 = vtanh.f32 %v2056_v40 }
 0x7ae   :  { %3559 = vtanh.f32 %v2057_v1 }
 0x7b9   :  { %v3556_v33 = vpop.eup %3555 }
 0x7ba   :  { %v3558_v17 = vpop.eup %3557  ;;  %v2067_v2 = vsub.f32 1.0, %v3556_v33 }
 0x7bb   :  { %v3560_v5 = vpop.eup %3559 }
 0x7bc   :  { %v2068_v25 = vmul.f32 %v3558_v17, %v2067_v2  ;;  %v2069_v37 = vmul.f32 %v3560_v5, %v3556_v33 }
 0x7be   :  { %v2070_v26 = vadd.f32 %v2069_v37, %v2068_v25 }
 0x7c0   :  { %3242 = vmatmul.mubr.msk.f32.vlgmr.msra.gmra.mxu1 %vm1733_vm15, %v2070_v26  ;;  %3420 = vmatmul.mubr.msk.f32.vlgmr.msra.gmra.mxu0 %vm1733_vm15, %v2070_v26 }
 0x7c1   :  { %3423 = vmatpush3.msk.msra.mxu0 %vm1567_vm11, %v4231_v18  ;;  %3247 = vmatpush1.msk.msra.mxu1 %vm1567_vm11, %v4233_v29  ;;  %v2221_v18 = vpop.f32.mrf.mxu0 }
 0x7c2   :  { %3424 = vmatprep.subr.mxu0 %v3641_v35  ;;  %2439 = vmatprep.subr.mxu1 %v4236_v62  ;;  %v1400_v62 = vld [vmem:[#allocation2 + $0x138] ss:$8 sm:$0x7] }
 0x7c3   :  { %3425 = vmatpush3.msra.mxu0 %v4240_v63  ;;  %2440 = vmatpush1.msra.mxu1 %v4242_v36  ;;  %v3416_v29 = vpop.f32.mrf.mxu0  ;;  %v2150_v63 = vpop.f32.mrf.mxu1  ;;  %v4415_v36 = vrot.slane %v1400_v62, %v3989_v7  ;;  %v4421_v48 = vrot.slane %v1400_v62, %v3716_v14  ;;  %v4425_v44 = vrot.slane %v1400_v62, %v3724_v16 }
 0x7c4   :  { %2473 = vmatprep.mubr.f32.mxu1 %v3641_v35  ;;  %3426 = vmatprep.mubr.msk.f32.mxu0 %vm3642_vm10, %v3641_v35 }
 0x7c5   :  { %3248 = vmatmul.mubr.msk.f32.vlgmr.msra.gmra.mxu1 %vm1563_vm13, %v4314_v15  ;;  %3427 = vmatmul.mubr.msk.f32.vlgmr.msra.gmra.mxu0 %vm1563_vm13, %v4314_v15 }
 0x7c6   :  { %3252 = vmatprep.subr.msk.mxu1 %vm1736_vm12, %v4263_v9  ;;  %3429 = vmatprep.subr.mxu0 %v3641_v35 }
 0x7c7   :  { %3253 = vmatpush1.msk.msra.mxu1 %vm1736_vm12, %v4269_v10  ;;  %2638 = vmatprep.mubr.f32.mxu1 %v3641_v35 }
 0x7c8   :  { %3430 = vmatpush3.msk.msra.mxu0 %vm1736_vm12, %v4261_v51  ;;  %3431 = vmatprep.mubr.msk.f32.mxu0 %vm3642_vm10, %v3641_v35 }
 0x7c9   :  { %3254 = vmatmul.mubr.msk.f32.vlgmr.msra.gmra.mxu1 %vm1733_vm15, %v2070_v26  ;;  %3432 = vmatmul.mubr.msk.f32.vlgmr.msra.gmra.mxu0 %vm1733_vm15, %v2070_v26 }
 0x7ca   :  { %3434 = vmatprep.subr.mxu0 %v3641_v35  ;;  %3257 = vmatprep.subr.msk.mxu1 %vm1567_vm11, %v4271_v55  ;;  %v2152_v55 = vpop.f32.mrf.mxu1 }
 0x7cb   :  { %3435 = vmatpush3.msk.msra.mxu0 %vm1567_vm11, %v4273_v3  ;;  %3258 = vmatpush1.msk.msra.mxu1 %vm1567_vm11, %v4278_v56 }
 0x7cc   :  { %3436 = vmatprep.subr.mxu0 %v3641_v35  ;;  %2749 = vmatprep.subr.mxu1 %v4282_v34 }
 0x7cd   :  { %3437 = vmatpush3.msra.mxu0 %v4284_v28  ;;  %2750 = vmatpush1.msra.mxu1 %v4290_v50 }
 0x7ce   :  { %2783 = vmatprep.mubr.f32.mxu1 %v3641_v35  ;;  %3438 = vmatprep.mubr.msk.f32.mxu0 %vm3642_vm10, %v3641_v35 }
 0x7cf   :  { %3263 = vmatprep.subr.msk.mxu1 %vm2074_vm14, %v4325_v52  ;;  %3441 = vmatprep.subr.mxu0 %v3641_v35 }
 0x880   :  { %v2374_v51 = vpop.f32.mrf.mxu0  ;;  %v2303_v50 = vpop.f32.mrf.mxu1 }
 0x881   :  { %v2375_v9 = vadd.f32 %v2374_v51, %v2221_v18  ;;  %v2304_v23 = vadd.f32 %v2303_v50, %v2150_v63 }
 0x882   :  { %v3421_v10 = vpop.f32.mrf.mxu0  ;;  %v2305_v60 = vpop.f32.mrf.mxu1 }
 0x883   :  { %v2396_v3 = vadd.f32 %v4415_v36, %v2375_v9  ;;  %v2306_v49 = vadd.f32 %v2305_v60, %v2152_v55  ;;  %v2394_v8 = vadd.f32 %v4421_v48, %v2304_v23 }
 0x885   :  { %v3245_v56 = vmul.f32 -1.442695, %v2396_v3  ;;  %v2546_v34 = vpop.f32.mrf.mxu0  ;;  %v2475_v7 = vpop.f32.mrf.mxu1  ;;  %v2395_v45 = vadd.f32 %v4425_v44, %v2306_v49 }
 0x886   :  { %v2555_v28 = vrot.slane %v2546_v34, 7  ;;  %v2553_v15 = vrot.slane %v2475_v7, 7 }
 0x887   :  { %3561 = vpow2.f32 %v3245_v56  ;;  %v3428_v41 = vpop.f32.mrf.mxu0  ;;  %v2477_v53 = vpop.f32.mrf.mxu1 }
 0x888   :  { %v2561_v57 = vadd.f32 %v2555_v28, %v4303_v58  ;;  %v2554_v39 = vrot.slane %v2477_v53, 7  ;;  %v2559_v38 = vadd.f32 %v2553_v15, %v4308_v54 }
 0x889   :  { %v2711_v27 = vpop.f32.mrf.mxu0  ;;  %v2640_v25 = vpop.f32.mrf.mxu1 }
 0x88a   :  { %v3251_v30 = vmul.f32 -1.442695, %v2561_v57  ;;  %v2560_v58 = vadd.f32 %v2554_v39, %v4310_v46 }
 0x88b   :  { %v3433_v12 = vpop.f32.mrf.mxu0  ;;  %v2642_v29 = vpop.f32.mrf.mxu1 }
 0x88c   :  { %3563 = vpow2.f32 %v3251_v30 }
 0x894   :  { %v3562_v42 = vpop.eup %3561 }
 0x895   :  { %v2402_v31 = vadd.f32 1.0, %v3562_v42 }
 0x897   :  { %3565 = vrcp.f32 %v2402_v31 }
 0x899   :  { %v3564_v52 = vpop.eup %3563 }
 0x89a   :  { %v2567_v4 = vadd.f32 1.0, %v3564_v52 }
 0x89c   :  { %3567 = vrcp.f32 %v2567_v4 }
 0x89d   :  { %3569 = vtanh.f32 %v2559_v38 }
 0x89e   :  { %3571 = vtanh.f32 %v2560_v58 }
 0x89f   :  { %3573 = vtanh.f32 %v2394_v8 }
 0x8a0   :  { %3575 = vtanh.f32 %v2395_v45 }
 0x8a4   :  { %v3566_v54 = vpop.eup %3565 }
 0x8a5   :  { %v2405_v22 = vsub.f32 1.0, %v3566_v54 }
 0x8a9   :  { %v3568_v14 = vpop.eup %3567 }
 0x8aa   :  { %v3570_v6 = vpop.eup %3569  ;;  %v2570_v11 = vsub.f32 1.0, %v3568_v14 }
 0x8ab   :  { %v3572_v24 = vpop.eup %3571 }
 0x8ac   :  { %v2571_v46 = vmul.f32 %v3570_v6, %v2570_v11  ;;  %v2572_v0 = vmul.f32 %v3572_v24, %v3568_v14  ;;  %v3574_v16 = vpop.eup %3573 }
 0x8ad   :  { %v2406_v1 = vmul.f32 %v3574_v16, %v2405_v22  ;;  %v3576_v33 = vpop.eup %3575 }
 0x8ae   :  { %v2573_v40 = vadd.f32 %v2572_v0, %v2571_v46  ;;  %v2407_v17 = vmul.f32 %v3576_v33, %v3566_v54 }
 0x8b0   :  { %v2716_v59 = vrot.slane %v2573_v40, 1  ;;  %v4438_v2 = vadd.f32 %v2407_v17, %v2406_v1 }
 0x8b2   :  { %3259 = vmatmul.mubr.msk.f32.vlgmr.msra.gmra.mxu1 %vm1563_vm13, %v2716_v59  ;;  %3439 = vmatmul.mubr.msk.f32.vlgmr.msra.gmra.mxu0 %vm1563_vm13, %v2716_v59 }
 0x8b3   :  { %3264 = vmatpush1.msk.msra.mxu1 %vm2074_vm14, %v4331_v43  ;;  %2942 = vmatprep.mubr.f32.mxu1 %v3641_v35 }
 0x8b4   :  { %3442 = vmatpush3.msk.msra.mxu0 %vm2074_vm14, %v4323_v13  ;;  %3443 = vmatprep.mubr.msk.f32.mxu0 %vm3642_vm10, %v3641_v35 }
 0x8b5   :  { %3446 = vmatprep.subr.mxu0 %v3641_v35  ;;  %3268 = vmatprep.subr.msk.mxu1 %vm1736_vm12, %v4335_v20 }
 0x8b6   :  { %3265 = vmatmul.mubr.msk.f32.vlgmr.msra.gmra.mxu1 %vm2071_vm0, %v4438_v2  ;;  %3444 = vmatmul.mubr.msk.f32.vlgmr.msra.gmra.mxu0 %vm2071_vm0, %v4438_v2 }
 0x8b7   :  { %3447 = vmatpush3.msk.msra.mxu0 %vm1736_vm12, %v4333_v21  ;;  %3269 = vmatpush1.msk.msra.mxu1 %vm1736_vm12, %v4340_v61 }
 0x8b8   :  { %3086 = vmatprep.mubr.f32.mxu1 %v3641_v35  ;;  %3448 = vmatprep.mubr.msk.f32.mxu0 %vm3642_vm10, %v3641_v35 }
 0x972   :  { %v2856_v13 = vpop.f32.mrf.mxu0  ;;  %v2785_v21 = vpop.f32.mrf.mxu1 }
 0x973   :  { %v2857_v43 = vadd.f32 %v2856_v13, %v2711_v27  ;;  %v2786_v63 = vadd.f32 %v2785_v21, %v2640_v25 }
 0x974   :  { %v3440_v5 = vpop.f32.mrf.mxu0  ;;  %v2787_v62 = vpop.f32.mrf.mxu1 }
 0x975   :  { %v2862_v20 = vadd.f32 %v2857_v43, %v4357_v47  ;;  %v2788_v61 = vadd.f32 %v2787_v62, %v2642_v29  ;;  %v2860_v9 = vadd.f32 %v2786_v63, %v4361_v32 }
 0x976   :  { %v3015_v37 = vpop.f32.mrf.mxu0 }
 0x977   :  { %v3262_v26 = vmul.f32 -1.442695, %v2862_v20  ;;  %v2861_v35 = vadd.f32 %v2788_v61, %v4364_v19  ;;  %v2944_v19 = vpop.f32.mrf.mxu1 }
 0x978   :  { %v3445_v18 = vpop.f32.mrf.mxu0 }
 0x979   :  { %3577 = vpow2.f32 %v3262_v26  ;;  %v2946_v60 = vpop.f32.mrf.mxu1 }
 0x986   :  { %v3578_v51 = vpop.eup %3577 }
 0x987   :  { %v2868_v10 = vadd.f32 1.0, %v3578_v51 }
 0x989   :  { %3579 = vrcp.f32 %v2868_v10 }
 0x98a   :  { %3581 = vtanh.f32 %v2860_v9 }
 0x98b   :  { %3583 = vtanh.f32 %v2861_v35 }
 0x996   :  { %v3580_v47 = vpop.eup %3579 }
 0x997   :  { %v3582_v55 = vpop.eup %3581  ;;  %v2871_v3 = vsub.f32 1.0, %v3580_v47 }
 0x998   :  { %v3584_v56 = vpop.eup %3583 }
 0x999   :  { %v2872_v34 = vmul.f32 %v3582_v55, %v2871_v3  ;;  %v2873_v28 = vmul.f32 %v3584_v56, %v3580_v47 }
 0x99b   :  { %v2874_v50 = vadd.f32 %v2873_v28, %v2872_v34 }
 0x99d   :  { %3270 = vmatmul.mubr.msk.f32.vlgmr.msra.gmra.mxu1 %vm1733_vm15, %v2874_v50  ;;  %3449 = vmatmul.mubr.msk.f32.vlgmr.msra.gmra.mxu0 %vm1733_vm15, %v2874_v50 }
 0xa5d   :  { %v3159_v41 = vpop.f32.mrf.mxu0  ;;  %v3088_v12 = vpop.f32.mrf.mxu1 }
 0xa5e   :  { %v3160_v57 = vadd.f32 %v3159_v41, %v3015_v37  ;;  %v3089_v53 = vadd.f32 %v3088_v12, %v2944_v19 }
 0xa5f   :  { %v3450_v32 = vpop.f32.mrf.mxu0  ;;  %v3090_v7 = vpop.f32.mrf.mxu1 }
 0xa60   :  { %v3165_v27 = vadd.f32 %v3160_v57, %v4415_v36  ;;  %v3091_v42 = vadd.f32 %v3090_v7, %v2946_v60  ;;  %v3163_v39 = vadd.f32 %v3089_v53, %v4421_v48 }
 0xa62   :  { %v3273_v30 = vmul.f32 -1.442695, %v3165_v27  ;;  %v3164_v52 = vadd.f32 %v3091_v42, %v4425_v44 }
 0xa64   :  { %3585 = vpow2.f32 %v3273_v30 }
 0xa71   :  { %v3586_v15 = vpop.eup %3585 }
 0xa72   :  { %v3171_v31 = vadd.f32 1.0, %v3586_v15 }
 0xa74   :  { %3587 = vrcp.f32 %v3171_v31 }
 0xa75   :  { %3589 = vtanh.f32 %v3163_v39 }
 0xa76   :  { %3591 = vtanh.f32 %v3164_v52 }
 0xa81   :  { %v3588_v38 = vpop.eup %3587 }
 0xa82   :  { %v3590_v23 = vpop.eup %3589  ;;  %v3174_v36 = vsub.f32 1.0, %v3588_v38 }
 0xa83   :  { %v3592_v4 = vpop.eup %3591 }
 0xa84   :  { %v3175_v58 = vmul.f32 %v3590_v23, %v3174_v36  ;;  %v3176_v49 = vmul.f32 %v3592_v4, %v3588_v38 }
 0xa86   :  { %v3177_v8 = vadd.f32 %v3176_v49, %v3175_v58 }
 0xa88   :  { %v3179_v45 = vrot.slane %v3177_v8, 7 }
 0xa8a   :  { %v3181_v48 = vsel %vm1567_vm11, %v4438_v2, %v3179_v45 }
 0xa8b   :  { %3183 = vst.msk [vmem:[#allocation5] sm:$0x3] %vm3182_vm1, %v3181_v48 }
 0xa8c   :  { %3625 = shalt.err (!%p3622_p9)
}
 0xa8d   :  { %3193 = dma.vmem_to_hbm [thread:$0]  %s3191_s20, 32, %s4470_s5, [#allocation4]  }
 0xa8e   :  { %3636 = dma.done.wait [#allocation4], 32  }
 0xa8f   :  { %3637 = vsyncadd [#allocation4], 4294967264 }
 0xa90   :  { %3197 = vsyncpa [#allocation3], 1 }
 0xa91   :  { %3198 = vsyncpa [#allocation4], 1 }

</bundles_post_ra>
